<compile_context>
chip_gen: v5e
topology: v5e:2x2
jax: 0.10.0
libtpu: 0.0.40
codegen_flags: <defaults>
</compile_context>

<pallas_src>
import functools
import numpy as np
import jax
import jax.numpy as jnp
from jax.experimental import pallas as pl
from jax.experimental.pallas import tpu as pltpu

# ----------------------------- config (small) -----------------------------
N, C_IN, T, V = 2, 16, 16, 16
C_OUT = C_IN            # in_channel == out_channel, stride == 1 -> identity residual
NUM_A = 3               # A.shape[0]
K_T = 9                 # unit_tcn temporal kernel size
PAD_T = (K_T - 1) // 2
BN_EPS = 1e-5


# ----------------------------- fused kernel --------------------------------
def _fused_kernel(x_ref, bd_ref, wg_ref, gs_ref, gsh_ref, wt_ref, ts_ref, tsh_ref, o_ref,
                  *, num_A, k_t, pad_t, V):
    # x_ref   : (N*Cin,  T*V)                    rows (n,c), lanes (t,v)
    # bd_ref  : (num_A, T*V, T*V)                kron(I_T, A_i) for the vertex contraction
    # wg_ref  : (N*Cout, num_A*N*Cin)            block-diag over n of the 3 conv1x1 weights
    # wt_ref  : (N*Cout, k_t*N*Cout)             block-diag over n of the temporal-conv weights
    # gs/gsh, ts/tsh : (N*Cout, 1)               fused BN scale / shift (conv bias folded in)
    x = x_ref[...]                                             # (32, 256) f32
    NC, TV = x.shape

    # ---- unit_gcn ----
    # A-contraction as lane-space block-diag matmuls, merged over the 3 branches by row-concat.
    z = jnp.concatenate(
        [jnp.dot(x, bd_ref[i], preferred_element_type=jnp.float32) for i in range(num_A)],
        axis=0)                                                # (num_A*N*Cin, T*V), rows (i,n,c)
    # The 3 fused 1x1 convs as a single K=num_A*N*Cin matmul, then BN(+bias) + ReLU.
    y = jnp.dot(wg_ref[...], z, preferred_element_type=jnp.float32)   # (N*Cout, T*V)
    y = jnp.maximum(y * gs_ref[...] + gsh_ref[...], 0.0)

    # ---- unit_tcn (kernel (9,1), pad (4,0)) + residual + final ReLU ----
    # Temporal zero-padding on the lane axis (128-aligned pads -> aligned concatenation),
    # then im2col of the 9 shifted taps into one K=k_t*N*Cout matmul.
    NCo = y.shape[0]
    padw = (pad_t * V + 127) // 128 * 128                      # 128 lanes of zeros per side
    padz = jnp.zeros((NCo, padw), jnp.float32)
    ypad = jnp.concatenate([padz, y, padz], axis=1)            # (N*Cout, padw + T*V + padw)
    base = padw - pad_t * V
    ycat = jnp.concatenate(
        [ypad[:, base + k * V: base + k * V + TV] for k in range(k_t)],
        axis=0)                                                # (k_t*N*Cout, T*V), rows (k,n,c)
    zt = jnp.dot(wt_ref[...], ycat, preferred_element_type=jnp.float32)  # (N*Cout, T*V)
    zt = zt * ts_ref[...] + tsh_ref[...]                       # BN (inference, bias folded)
    # TODO(synk): nn.Dropout(0.5) in training mode would need pltpu.prng_* masking; eval identity used.
    o_ref[...] = jnp.maximum(zt + x, 0.0)                      # identity residual + ReLU


def fused_forward(x2, BD, Wg_big, gs, gsh, Wt_big, ts, tsh, *, k_t, pad_t, V):
    NC, TV = x2.shape
    NCo = Wg_big.shape[0]
    num_A = BD.shape[0]
    kernel = functools.partial(_fused_kernel, num_A=num_A, k_t=k_t, pad_t=pad_t, V=V)
    return pl.pallas_call(
        kernel,
        out_shape=jax.ShapeDtypeStruct((NCo, TV), jnp.float32),
        grid_spec=pltpu.PrefetchScalarGridSpec(
            num_scalar_prefetch=0,
            grid=(1,),                                          # single step: whole problem in VMEM
            in_specs=[
                pl.BlockSpec((NC, TV), lambda i: (0, 0)),
                pl.BlockSpec(BD.shape, lambda i: (0, 0, 0)),
                pl.BlockSpec(Wg_big.shape, lambda i: (0, 0)),
                pl.BlockSpec(gs.shape, lambda i: (0, 0)),
                pl.BlockSpec(gsh.shape, lambda i: (0, 0)),
                pl.BlockSpec(Wt_big.shape, lambda i: (0, 0)),
                pl.BlockSpec(ts.shape, lambda i: (0, 0)),
                pl.BlockSpec(tsh.shape, lambda i: (0, 0)),
            ],
            out_specs=pl.BlockSpec((NCo, TV), lambda i: (0, 0)),
        ),
        compiler_params=pltpu.CompilerParams(dimension_semantics=("arbitrary",)),
    )(x2, BD, Wg_big, gs, gsh, Wt_big, ts, tsh)


# ----------------------------- module wrapper ------------------------------
def tcn_gcn_unit_forward(x_nchw, p):
    N_, Cin, T_, V_ = x_nchw.shape
    numA, _, Cout = p['gcn_w'].shape
    assert Cin == Cout  # identity-residual branch of TCN_GCN_unit (stride 1)

    # NCHW (N,C,T,V) -> kernel layout (N*C, T*V): a pure reshape, no transposes.
    x2 = x_nchw.reshape(N_ * Cin, T_ * V_)

    # Host-side constant packing (all cheap XLA ops on tiny tensors):
    eyeT = jnp.eye(T_, dtype=jnp.float32)
    eyeN = jnp.eye(N_, dtype=jnp.float32)
    # kron(I_T, A_i): vertex contraction as a lane-space matmul.
    BD = jnp.einsum('tu,iwv->itwuv', eyeT, p['A']).reshape(numA, T_ * V_, T_ * V_)
    # Wg_big[(n,o),(i,m,c)] = delta(n,m) * W_i[c,o]   (3 conv branches merged, block-diag over n)
    Wg_big = jnp.einsum('nm,ico->noimc', eyeN, p['gcn_w']).reshape(N_ * Cout, numA * N_ * Cin)
    # Wt_big[(n,o),(k,m,c)] = delta(n,m) * Wt[k,c,o]  (9 taps merged, block-diag over n)
    Wt_big = jnp.einsum('nm,kco->nokmc', eyeN, p['tcn_w']).reshape(N_ * Cout, K_T * N_ * Cout)

    # Fused inference BN affine, with conv biases folded into the shift.
    g_scale = p['gcn_bn_gamma'] / jnp.sqrt(p['gcn_bn_var'] + BN_EPS)
    g_shift = p['gcn_bn_beta'] - p['gcn_bn_mean'] * g_scale + jnp.sum(p['gcn_bias'], 0) * g_scale
    t_scale = p['tcn_bn_gamma'] / jnp.sqrt(p['tcn_bn_var'] + BN_EPS)
    t_shift = p['tcn_bn_beta'] - p['tcn_bn_mean'] * t_scale + p['tcn_bias'] * t_scale
    gs = jnp.tile(g_scale, (N_,))[:, None]      # (N*Cout, 1), row order (n, o)
    gsh = jnp.tile(g_shift, (N_,))[:, None]
    ts = jnp.tile(t_scale, (N_,))[:, None]
    tsh = jnp.tile(t_shift, (N_,))[:, None]

    out2 = fused_forward(x2, BD, Wg_big, gs, gsh, Wt_big, ts, tsh,
                         k_t=K_T, pad_t=PAD_T, V=V_)
    return out2.reshape(N_, Cout, T_, V_)       # kernel layout -> NCHW: pure reshape


# ----------------------------- pure-JAX reference --------------------------
def reference_forward(x, p):
    y = None
    for i in range(NUM_A):
        xa = jnp.einsum('nctw,wv->nctv', x, p['A'][i])        # x.view(-1,V).mm(A_i)
        yi = jnp.einsum('nctv,co->notv', xa, p['gcn_w'][i]) + p['gcn_bias'][i][None, :, None, None]
        y = yi if y is None else y + yi

    def bn(z, g, b, m, v):
        return (z - m[None, :, None, None]) / jnp.sqrt(v[None, :, None, None] + BN_EPS) \
            * g[None, :, None, None] + b[None, :, None, None]

    y = jnp.maximum(bn(y, p['gcn_bn_gamma'], p['gcn_bn_beta'],
                       p['gcn_bn_mean'], p['gcn_bn_var']), 0.0)
    yp = jnp.pad(y, ((0, 0), (0, 0), (PAD_T, PAD_T), (0, 0)))
    z = jnp.zeros((N, C_OUT, T, V), jnp.float32)
    for k in range(K_T):
        z = z + jnp.einsum('nctv,co->notv', yp[:, :, k:k + T, :], p['tcn_w'][k])
    z = z + p['tcn_bias'][None, :, None, None]
    z = bn(z, p['tcn_bn_gamma'], p['tcn_bn_beta'], p['tcn_bn_mean'], p['tcn_bn_var'])
    return jnp.maximum(z + x, 0.0)


# ----------------------------- main ----------------------------------------
if __name__ == "__main__":
    key = jax.random.PRNGKey(0)
    ks = jax.random.split(key, 16)

    params = {
        'A':            jax.random.uniform(ks[0], (NUM_A, V, V), jnp.float32, 0.0, 0.5),
        'gcn_w':        0.1 * jax.random.normal(ks[1], (NUM_A, C_IN, C_OUT), jnp.float32),
        'gcn_bias':     0.05 * jax.random.normal(ks[2], (NUM_A, C_OUT), jnp.float32),
        'gcn_bn_gamma': 1.0 + 0.1 * jax.random.normal(ks[3], (C_OUT,), jnp.float32),
        'gcn_bn_beta':  0.05 * jax.random.normal(ks[4], (C_OUT,), jnp.float32),
        'gcn_bn_mean':  0.1 * jax.random.normal(ks[5], (C_OUT,), jnp.float32),
        'gcn_bn_var':   jax.random.uniform(ks[6], (C_OUT,), jnp.float32, 0.5, 1.5),
        'tcn_w':        0.05 * jax.random.normal(ks[7], (K_T, C_OUT, C_OUT), jnp.float32),
        'tcn_bias':     0.05 * jax.random.normal(ks[8], (C_OUT,), jnp.float32),
        'tcn_bn_gamma': 1.0 + 0.1 * jax.random.normal(ks[9], (C_OUT,), jnp.float32),
        'tcn_bn_beta':  0.05 * jax.random.normal(ks[10], (C_OUT,), jnp.float32),
        'tcn_bn_mean':  0.1 * jax.random.normal(ks[11], (C_OUT,), jnp.float32),
        'tcn_bn_var':   jax.random.uniform(ks[12], (C_OUT,), jnp.float32, 0.5, 1.5),
    }
    x = jax.random.normal(ks[13], (N, C_IN, T, V), jnp.float32)   # PyTorch NCHW = (N, C, T, V)

    out = jax.block_until_ready(tcn_gcn_unit_forward(x, params))
    ref = jax.block_until_ready(reference_forward(x, params))

    assert out.shape == (N, C_OUT, T, V), out.shape
    np.testing.assert_allclose(np.asarray(out), np.asarray(ref), rtol=2e-2, atol=2e-2)
    print("KERNEL_OK")
</pallas_src>

<mosaic_0001>
module attributes {stable_mosaic.version = 11 : i64} {
  func.func @_fused_kernel(%arg0: i32, %arg1: memref<32x256xf32, #tpu.memory_space<vmem>>, %arg2: memref<3x256x256xf32, #tpu.memory_space<vmem>>, %arg3: memref<32x96xf32, #tpu.memory_space<vmem>>, %arg4: memref<32x1xf32, #tpu.memory_space<vmem>>, %arg5: memref<32x1xf32, #tpu.memory_space<vmem>>, %arg6: memref<32x288xf32, #tpu.memory_space<vmem>>, %arg7: memref<32x1xf32, #tpu.memory_space<vmem>>, %arg8: memref<32x1xf32, #tpu.memory_space<vmem>>, %arg9: memref<32x256xf32, #tpu.memory_space<vmem>>) attributes {dimension_semantics = [#tpu.dimension_semantics<arbitrary>], iteration_bounds = array<i64: 1>, scalar_prefetch = 0 : i64, scratch_operands = 0 : i64, tpu.core_type = #tpu.core_type<tc>, window_params = [{pipeline_mode = #tpu.pipeline_mode<synchronous>, transform_indices = @transform_0, window_bounds = array<i64: 32, 256>}, {pipeline_mode = #tpu.pipeline_mode<synchronous>, transform_indices = @transform_1, window_bounds = array<i64: 3, 256, 256>}, {pipeline_mode = #tpu.pipeline_mode<synchronous>, transform_indices = @transform_2, window_bounds = array<i64: 32, 96>}, {pipeline_mode = #tpu.pipeline_mode<synchronous>, transform_indices = @transform_3, window_bounds = array<i64: 32, 1>}, {pipeline_mode = #tpu.pipeline_mode<synchronous>, transform_indices = @transform_4, window_bounds = array<i64: 32, 1>}, {pipeline_mode = #tpu.pipeline_mode<synchronous>, transform_indices = @transform_5, window_bounds = array<i64: 32, 288>}, {pipeline_mode = #tpu.pipeline_mode<synchronous>, transform_indices = @transform_6, window_bounds = array<i64: 32, 1>}, {pipeline_mode = #tpu.pipeline_mode<synchronous>, transform_indices = @transform_7, window_bounds = array<i64: 32, 1>}, {pipeline_mode = #tpu.pipeline_mode<synchronous>, transform_indices = @transform_8, window_bounds = array<i64: 32, 256>}]} {
    %c0 = arith.constant 0 : index
    %c0_0 = arith.constant 0 : index
    %0 = vector.load %arg1[%c0, %c0_0] : memref<32x256xf32, #tpu.memory_space<vmem>>, vector<32x256xf32>
    %c0_1 = arith.constant 0 : index
    %c0_2 = arith.constant 0 : index
    %c0_3 = arith.constant 0 : index
    %1 = vector.load %arg2[%c0_1, %c0_2, %c0_3] : memref<3x256x256xf32, #tpu.memory_space<vmem>>, vector<1x256x256xf32>
    %2 = vector.shape_cast %1 : vector<1x256x256xf32> to vector<256x256xf32>
    %cst = arith.constant dense<0.000000e+00> : vector<32x256xf32>
    %3 = tpu.matmul %0, %2, %cst {dimension_numbers = #tpu.dot_dimension_numbers<[1], [0], [0], [1], [0, 0, 1, 1], [], []>} : vector<32x256xf32>, vector<256x256xf32>, vector<32x256xf32> -> vector<32x256xf32>
    %c1 = arith.constant 1 : index
    %c0_4 = arith.constant 0 : index
    %c0_5 = arith.constant 0 : index
    %4 = vector.load %arg2[%c1, %c0_4, %c0_5] : memref<3x256x256xf32, #tpu.memory_space<vmem>>, vector<1x256x256xf32>
    %5 = vector.shape_cast %4 : vector<1x256x256xf32> to vector<256x256xf32>
    %cst_6 = arith.constant dense<0.000000e+00> : vector<32x256xf32>
    %6 = tpu.matmul %0, %5, %cst_6 {dimension_numbers = #tpu.dot_dimension_numbers<[1], [0], [0], [1], [0, 0, 1, 1], [], []>} : vector<32x256xf32>, vector<256x256xf32>, vector<32x256xf32> -> vector<32x256xf32>
    %c2 = arith.constant 2 : index
    %c0_7 = arith.constant 0 : index
    %c0_8 = arith.constant 0 : index
    %7 = vector.load %arg2[%c2, %c0_7, %c0_8] : memref<3x256x256xf32, #tpu.memory_space<vmem>>, vector<1x256x256xf32>
    %8 = vector.shape_cast %7 : vector<1x256x256xf32> to vector<256x256xf32>
    %cst_9 = arith.constant dense<0.000000e+00> : vector<32x256xf32>
    %9 = tpu.matmul %0, %8, %cst_9 {dimension_numbers = #tpu.dot_dimension_numbers<[1], [0], [0], [1], [0, 0, 1, 1], [], []>} : vector<32x256xf32>, vector<256x256xf32>, vector<32x256xf32> -> vector<32x256xf32>
    %10 = tpu.concatenate %3, %6, %9 in 0 : vector<32x256xf32>, vector<32x256xf32>, vector<32x256xf32> -> vector<96x256xf32>
    %c0_10 = arith.constant 0 : index
    %c0_11 = arith.constant 0 : index
    %11 = vector.load %arg3[%c0_10, %c0_11] : memref<32x96xf32, #tpu.memory_space<vmem>>, vector<32x96xf32>
    %cst_12 = arith.constant dense<0.000000e+00> : vector<32x256xf32>
    %12 = tpu.matmul %11, %10, %cst_12 {dimension_numbers = #tpu.dot_dimension_numbers<[1], [0], [0], [1], [0, 0, 1, 1], [], []>} : vector<32x96xf32>, vector<96x256xf32>, vector<32x256xf32> -> vector<32x256xf32>
    %c0_13 = arith.constant 0 : index
    %c0_14 = arith.constant 0 : index
    %13 = vector.load %arg4[%c0_13, %c0_14] : memref<32x1xf32, #tpu.memory_space<vmem>>, vector<32x1xf32>
    %14 = vector.broadcast %13 : vector<32x1xf32> to vector<32x256xf32>
    %15 = arith.mulf %12, %14 : vector<32x256xf32>
    %c0_15 = arith.constant 0 : index
    %c0_16 = arith.constant 0 : index
    %16 = vector.load %arg5[%c0_15, %c0_16] : memref<32x1xf32, #tpu.memory_space<vmem>>, vector<32x1xf32>
    %17 = vector.broadcast %16 : vector<32x1xf32> to vector<32x256xf32>
    %18 = arith.addf %15, %17 : vector<32x256xf32>
    %cst_17 = arith.constant 0.000000e+00 : f32
    %19 = vector.broadcast %cst_17 : f32 to vector<32x256xf32>
    %20 = arith.maximumf %18, %19 : vector<32x256xf32>
    %cst_18 = arith.constant 0.000000e+00 : f32
    %21 = vector.broadcast %cst_18 : f32 to vector<32x128xf32>
    %22 = tpu.concatenate %21, %20, %21 in 1 : vector<32x128xf32>, vector<32x256xf32>, vector<32x128xf32> -> vector<32x512xf32>
    %23 = vector.extract_strided_slice %22 {offsets = [0, 64], sizes = [32, 256], strides = [1, 1]} : vector<32x512xf32> to vector<32x256xf32>
    %24 = vector.extract_strided_slice %22 {offsets = [0, 80], sizes = [32, 256], strides = [1, 1]} : vector<32x512xf32> to vector<32x256xf32>
    %25 = vector.extract_strided_slice %22 {offsets = [0, 96], sizes = [32, 256], strides = [1, 1]} : vector<32x512xf32> to vector<32x256xf32>
    %26 = vector.extract_strided_slice %22 {offsets = [0, 112], sizes = [32, 256], strides = [1, 1]} : vector<32x512xf32> to vector<32x256xf32>
    %27 = vector.extract_strided_slice %22 {offsets = [0, 128], sizes = [32, 256], strides = [1, 1]} : vector<32x512xf32> to vector<32x256xf32>
    %28 = vector.extract_strided_slice %22 {offsets = [0, 144], sizes = [32, 256], strides = [1, 1]} : vector<32x512xf32> to vector<32x256xf32>
    %29 = vector.extract_strided_slice %22 {offsets = [0, 160], sizes = [32, 256], strides = [1, 1]} : vector<32x512xf32> to vector<32x256xf32>
    %30 = vector.extract_strided_slice %22 {offsets = [0, 176], sizes = [32, 256], strides = [1, 1]} : vector<32x512xf32> to vector<32x256xf32>
    %31 = vector.extract_strided_slice %22 {offsets = [0, 192], sizes = [32, 256], strides = [1, 1]} : vector<32x512xf32> to vector<32x256xf32>
    %32 = tpu.concatenate %23, %24, %25, %26, %27, %28, %29, %30, %31 in 0 : vector<32x256xf32>, vector<32x256xf32>, vector<32x256xf32>, vector<32x256xf32>, vector<32x256xf32>, vector<32x256xf32>, vector<32x256xf32>, vector<32x256xf32>, vector<32x256xf32> -> vector<288x256xf32>
    %c0_19 = arith.constant 0 : index
    %c0_20 = arith.constant 0 : index
    %33 = vector.load %arg6[%c0_19, %c0_20] : memref<32x288xf32, #tpu.memory_space<vmem>>, vector<32x288xf32>
    %cst_21 = arith.constant dense<0.000000e+00> : vector<32x256xf32>
    %34 = tpu.matmul %33, %32, %cst_21 {dimension_numbers = #tpu.dot_dimension_numbers<[1], [0], [0], [1], [0, 0, 1, 1], [], []>} : vector<32x288xf32>, vector<288x256xf32>, vector<32x256xf32> -> vector<32x256xf32>
    %c0_22 = arith.constant 0 : index
    %c0_23 = arith.constant 0 : index
    %35 = vector.load %arg7[%c0_22, %c0_23] : memref<32x1xf32, #tpu.memory_space<vmem>>, vector<32x1xf32>
    %36 = vector.broadcast %35 : vector<32x1xf32> to vector<32x256xf32>
    %37 = arith.mulf %34, %36 : vector<32x256xf32>
    %c0_24 = arith.constant 0 : index
    %c0_25 = arith.constant 0 : index
    %38 = vector.load %arg8[%c0_24, %c0_25] : memref<32x1xf32, #tpu.memory_space<vmem>>, vector<32x1xf32>
    %39 = vector.broadcast %38 : vector<32x1xf32> to vector<32x256xf32>
    %40 = arith.addf %37, %39 : vector<32x256xf32>
    %41 = arith.addf %40, %0 : vector<32x256xf32>
    %cst_26 = arith.constant 0.000000e+00 : f32
    %42 = vector.broadcast %cst_26 : f32 to vector<32x256xf32>
    %43 = arith.maximumf %41, %42 : vector<32x256xf32>
    %c0_27 = arith.constant 0 : index
    %c0_28 = arith.constant 0 : index
    %44 = vector.load %arg9[%c0_27, %c0_28] : memref<32x256xf32, #tpu.memory_space<vmem>>, vector<32x256xf32>
    tpu.vector_store %arg9[%c0_27, %c0_28], %43 {strides = array<i32>} : memref<32x256xf32, #tpu.memory_space<vmem>>, vector<32x256xf32>,
    return
  }
  func.func @transform_0(%arg0: i32) -> (i32, i32) {
    %c0_i32 = arith.constant 0 : i32
    %c0_i32_0 = arith.constant 0 : i32
    %c0_i32_1 = arith.constant 0 : i32
    return %c0_i32, %c0_i32_0 : i32, i32
  }
  func.func @transform_1(%arg0: i32) -> (i32, i32, i32) {
    %c0_i32 = arith.constant 0 : i32
    %c0_i32_0 = arith.constant 0 : i32
    %c0_i32_1 = arith.constant 0 : i32
    %c0_i32_2 = arith.constant 0 : i32
    return %c0_i32, %c0_i32_0, %c0_i32_1 : i32, i32, i32
  }
  func.func @transform_2(%arg0: i32) -> (i32, i32) {
    %c0_i32 = arith.constant 0 : i32
    %c0_i32_0 = arith.constant 0 : i32
    %c0_i32_1 = arith.constant 0 : i32
    return %c0_i32, %c0_i32_0 : i32, i32
  }
  func.func @transform_3(%arg0: i32) -> (i32, i32) {
    %c0_i32 = arith.constant 0 : i32
    %c0_i32_0 = arith.constant 0 : i32
    %c0_i32_1 = arith.constant 0 : i32
    return %c0_i32, %c0_i32_0 : i32, i32
  }
  func.func @transform_4(%arg0: i32) -> (i32, i32) {
    %c0_i32 = arith.constant 0 : i32
    %c0_i32_0 = arith.constant 0 : i32
    %c0_i32_1 = arith.constant 0 : i32
    return %c0_i32, %c0_i32_0 : i32, i32
  }
  func.func @transform_5(%arg0: i32) -> (i32, i32) {
    %c0_i32 = arith.constant 0 : i32
    %c0_i32_0 = arith.constant 0 : i32
    %c0_i32_1 = arith.constant 0 : i32
    return %c0_i32, %c0_i32_0 : i32, i32
  }
  func.func @transform_6(%arg0: i32) -> (i32, i32) {
    %c0_i32 = arith.constant 0 : i32
    %c0_i32_0 = arith.constant 0 : i32
    %c0_i32_1 = arith.constant 0 : i32
    return %c0_i32, %c0_i32_0 : i32, i32
  }
  func.func @transform_7(%arg0: i32) -> (i32, i32) {
    %c0_i32 = arith.constant 0 : i32
    %c0_i32_0 = arith.constant 0 : i32
    %c0_i32_1 = arith.constant 0 : i32
    return %c0_i32, %c0_i32_0 : i32, i32
  }
  func.func @transform_8(%arg0: i32) -> (i32, i32) {
    %c0_i32 = arith.constant 0 : i32
    %c0_i32_0 = arith.constant 0 : i32
    %c0_i32_1 = arith.constant 0 : i32
    return %c0_i32, %c0_i32_0 : i32, i32
  }
}

</mosaic_0001>

<bundles_post_ra>
// kernel: tpu_custom_call.1
= control target key start
LH: loop header
LB: loop body
LE: loop exit
PB: predicated region body
PF: predicated region fallthrough
CT: control target
= control target key end

     0   :  { %13 = vsyncpa [#allocation3], 0  ;;  %s3142_s0 = inlined_call_operand.vmem [shape: f32[32,256], index: 0, kind: input, shape index: {}]   ;;  %s3143_s1 = inlined_call_operand.hbm [shape: f32[3,256,256], index: 1, kind: input, shape index: {}]   ;;  %s3144_s2 = inlined_call_operand.vmem [shape: f32[32,96], index: 2, kind: input, shape index: {}]   ;;  %s3145_s3 = inlined_call_operand.vmem [shape: f32[32,1], index: 3, kind: input, shape index: {}]   ;;  %s3146_s4 = inlined_call_operand.vmem [shape: f32[32,1], index: 4, kind: input, shape index: {}]   ;;  %s3147_s5 = inlined_call_operand.hbm [shape: f32[32,288], index: 5, kind: input, shape index: {}]   ;;  %s3148_s6 = inlined_call_operand.vmem [shape: f32[32,1], index: 6, kind: input, shape index: {}]   ;;  %s3149_s7 = inlined_call_operand.vmem [shape: f32[32,1], index: 7, kind: input, shape index: {}]   ;;  %s3150_s8 = inlined_call_operand.hbm [shape: f32[32,256], index: 8, kind: output, shape index: {}]  }
   0x1   :  { %14 = vsyncpa [#allocation6], 0 }
   0x2   :  { %15 = vsyncpa [#allocation4], 0  ;;  %s22_s29 = sshll.u32 %s3143_s1, 4  ;;  %s2028_s30 = smov [#allocation2]   ;;  %s23_s29 = int_to_ptr.hbm [resolvable:$true] %s22_s29 }
   0x3   :  { %s24_s9 = sshll.u32 %s2028_s30, 4  ;;  %s41_s12 = sshll.u32 %s3147_s5, 4  ;;  %s25_s9 = int_to_ptr.vmem [resolvable:$true] %s24_s9  ;;  %s42_s12 = int_to_ptr.hbm [resolvable:$true] %s41_s12 }
   0x4   :  { %s2029_s13 = smov 256   ;;  %s2030_s14 = smov 16  }
   0x5   :  { %30 = dma.hbm_to_vmem [thread:$0]  %s23_s29, 24576, %s25_s9, [#allocation3], %s2029_s13, %s2029_s13, %s2030_s14  }
   0x6   :  { %s2031_s15 = smov [#allocation5]   ;;  %s2032_s17 = smov 384  }
   0x7   :  { %s43_s16 = sshll.u32 %s2031_s15, 4  ;;  %s2033_s1 = smov 24   ;;  %s44_s16 = int_to_ptr.vmem [resolvable:$true] %s43_s16 }
   0x8   :  { %49 = dma.hbm_to_vmem [thread:$0]  %s42_s12, 1536, %s44_s16, [#allocation6], %s2032_s17, %s2032_s17, %s2033_s1  }
   0x9   :  { %2022 = dma.done.wait [#allocation3], 24576  }
   0xa   :  { %2023 = vsyncadd [#allocation3], 4294942720 }
   0xb   :  { %2024 = dma.done.wait [#allocation6], 1536  }
   0xc   :  { %2025 = vsyncadd [#allocation6], 4294965760  ;;  %v100_v0 = vld [vmem:[#allocation2 + $0xf0] sm:$0xff]  ;;  %v101_v2 = vld [vmem:[#allocation2 + $0xf8] sm:$0xff]  ;;  %vm616_vm0 = vcmask 785408   ;;  %s2036_s11 = smov 80  }
   0xd   :  { %v132_v1 = vld [vmem:[#allocation2 + $0x1f0] sm:$0xff]  ;;  %134 = vmatpush.msra.mxu0 %v100_v0  ;;  %v133_v3 = vld [vmem:[#allocation2 + $0x1f8] sm:$0xff]  ;;  %v98_v4 = vld [vmem:[#allocation2 + $0xe0] sm:$0xff]  ;;  %192 = vmatpush.msra.mxu2 %v101_v2  ;;  %s2038_s12 = smov 112   ;;  %s2039_s15 = smov 48   ;;  %vm786_vm1 = vcmask 916480  }
   0xe   :  { %163 = vmatpush.msra.mxu1 %v132_v1  ;;  %v130_v5 = vld [vmem:[#allocation2 + $0x1e0] sm:$0xff]  ;;  %221 = vmatpush.msra.mxu3 %v133_v3  ;;  %v99_v6 = vld [vmem:[#allocation2 + $0xe8] sm:$0xff]  ;;  %v96_v8 = vld [vmem:[#allocation2 + $0xd0] sm:$0xff]  ;;  %s2040_s16 = smov 64   ;;  %s2041_s17 = smov 32   ;;  %vm839_vm2 = vcmask 654336  }
   0xf   :  { %v131_v7 = vld [vmem:[#allocation2 + $0x1e8] sm:$0xff]  ;;  %135 = vmatpush.msra.mxu0 %v98_v4  ;;  %v128_v9 = vld [vmem:[#allocation2 + $0x1d0] sm:$0xff]  ;;  %v97_v10 = vld [vmem:[#allocation2 + $0xd8] sm:$0xff]  ;;  %193 = vmatpush.msra.mxu2 %v99_v6  ;;  %vm914_vm3 = vcmask 261120   ;;  %vm887_vm4 = vcmask 392192   ;;  %vm941_vm5 = vcmask 130048  }
  0x10   :  { %164 = vmatpush.msra.mxu1 %v130_v5  ;;  %v129_v11 = vld [vmem:[#allocation2 + $0x1d8] sm:$0xff]  ;;  %222 = vmatpush.msra.mxu3 %v131_v7  ;;  %v94_v12 = vld [vmem:[#allocation2 + $0xc0] sm:$0xff]  ;;  %v95_v14 = vld [vmem:[#allocation2 + $0xc8] sm:$0xff]  ;;  %vm864_vm6 = vcmask 523264   ;;  %s2042_s19 = smov [#allocation7]   ;;  %s1544_s23 = sshll.u32 %s3150_s8, 4  ;;  %s1545_s23 = int_to_ptr.hbm [resolvable:$true] %s1544_s23 }
  0x11   :  { %v126_v13 = vld [vmem:[#allocation2 + $0x1c0] sm:$0xff]  ;;  %136 = vmatpush.msra.mxu0 %v96_v8  ;;  %v127_v15 = vld [vmem:[#allocation2 + $0x1c8] sm:$0xff]  ;;  %194 = vmatpush.msra.mxu2 %v97_v10  ;;  %v92_v16 = vld [vmem:[#allocation2 + $0xb0] sm:$0xff]  ;;  %s1542_s20 = sshll.u32 %s2042_s19, 4  ;;  %s1543_s20 = int_to_ptr.vmem [resolvable:$true] %s1542_s20 }
  0x12   :  { %165 = vmatpush.msra.mxu1 %v128_v9  ;;  %223 = vmatpush.msra.mxu3 %v129_v11  ;;  %v124_v17 = vld [vmem:[#allocation2 + $0x1b0] sm:$0xff]  ;;  %v93_v18 = vld [vmem:[#allocation2 + $0xb8] sm:$0xff]  ;;  %v90_v20 = vld [vmem:[#allocation2 + $0xa0] sm:$0xff] }
  0x13   :  { %137 = vmatpush.msra.mxu0 %v94_v12  ;;  %v125_v19 = vld [vmem:[#allocation2 + $0x1b8] sm:$0xff]  ;;  %195 = vmatpush.msra.mxu2 %v95_v14  ;;  %v122_v21 = vld [vmem:[#allocation2 + $0x1a0] sm:$0xff]  ;;  %v91_v22 = vld [vmem:[#allocation2 + $0xa8] sm:$0xff] }
  0x14   :  { %166 = vmatpush.msra.mxu1 %v126_v13  ;;  %224 = vmatpush.msra.mxu3 %v127_v15  ;;  %v123_v23 = vld [vmem:[#allocation2 + $0x1a8] sm:$0xff]  ;;  %v88_v24 = vld [vmem:[#allocation2 + $0x90] sm:$0xff]  ;;  %v89_v26 = vld [vmem:[#allocation2 + $0x98] sm:$0xff] }
  0x15   :  { %138 = vmatpush.msra.mxu0 %v92_v16  ;;  %196 = vmatpush.msra.mxu2 %v93_v18  ;;  %v120_v25 = vld [vmem:[#allocation2 + $0x190] sm:$0xff]  ;;  %v121_v27 = vld [vmem:[#allocation2 + $0x198] sm:$0xff]  ;;  %v86_v28 = vld [vmem:[#allocation2 + $0x80] sm:$0xff] }
  0x16   :  { %167 = vmatpush.msra.mxu1 %v124_v17  ;;  %225 = vmatpush.msra.mxu3 %v125_v19  ;;  %v118_v29 = vld [vmem:[#allocation2 + $0x180] sm:$0xff]  ;;  %v87_v30 = vld [vmem:[#allocation2 + $0x88] sm:$0xff]  ;;  %v84_v32 = vld [vmem:[#allocation2 + $0x70] sm:$0xff] }
  0x17   :  { %139 = vmatpush.msra.mxu0 %v90_v20  ;;  %197 = vmatpush.msra.mxu2 %v91_v22  ;;  %v119_v31 = vld [vmem:[#allocation2 + $0x188] sm:$0xff]  ;;  %v116_v33 = vld [vmem:[#allocation2 + $0x170] sm:$0xff]  ;;  %v85_v34 = vld [vmem:[#allocation2 + $0x78] sm:$0xff] }
  0x18   :  { %168 = vmatpush.msra.mxu1 %v122_v21  ;;  %226 = vmatpush.msra.mxu3 %v123_v23  ;;  %v117_v35 = vld [vmem:[#allocation2 + $0x178] sm:$0xff]  ;;  %v82_v36 = vld [vmem:[#allocation2 + $0x60] sm:$0xff]  ;;  %v83_v38 = vld [vmem:[#allocation2 + $0x68] sm:$0xff] }
  0x19   :  { %140 = vmatpush.msra.mxu0 %v88_v24  ;;  %198 = vmatpush.msra.mxu2 %v89_v26  ;;  %v114_v37 = vld [vmem:[#allocation2 + $0x160] sm:$0xff]  ;;  %v115_v39 = vld [vmem:[#allocation2 + $0x168] sm:$0xff]  ;;  %v80_v40 = vld [vmem:[#allocation2 + $0x50] sm:$0xff] }
  0x1a   :  { %169 = vmatpush.msra.mxu1 %v120_v25  ;;  %227 = vmatpush.msra.mxu3 %v121_v27  ;;  %v112_v41 = vld [vmem:[#allocation2 + $0x150] sm:$0xff]  ;;  %v81_v42 = vld [vmem:[#allocation2 + $0x58] sm:$0xff]  ;;  %v78_v44 = vld [vmem:[#allocation2 + $0x40] sm:$0xff] }
  0x1b   :  { %141 = vmatpush.msra.mxu0 %v86_v28  ;;  %199 = vmatpush.msra.mxu2 %v87_v30  ;;  %v113_v43 = vld [vmem:[#allocation2 + $0x158] sm:$0xff]  ;;  %v110_v45 = vld [vmem:[#allocation2 + $0x140] sm:$0xff]  ;;  %v79_v46 = vld [vmem:[#allocation2 + $0x48] sm:$0xff] }
  0x1c   :  { %170 = vmatpush.msra.mxu1 %v118_v29  ;;  %228 = vmatpush.msra.mxu3 %v119_v31  ;;  %v111_v47 = vld [vmem:[#allocation2 + $0x148] sm:$0xff]  ;;  %v76_v48 = vld [vmem:[#allocation2 + $0x30] sm:$0xff]  ;;  %v77_v50 = vld [vmem:[#allocation2 + $0x38] sm:$0xff] }
  0x1d   :  { %142 = vmatpush.msra.mxu0 %v84_v32  ;;  %200 = vmatpush.msra.mxu2 %v85_v34  ;;  %v108_v49 = vld [vmem:[#allocation2 + $0x130] sm:$0xff]  ;;  %v109_v51 = vld [vmem:[#allocation2 + $0x138] sm:$0xff]  ;;  %v74_v52 = vld [vmem:[#allocation2 + $0x20] sm:$0xff] }
  0x1e   :  { %171 = vmatpush.msra.mxu1 %v116_v33  ;;  %229 = vmatpush.msra.mxu3 %v117_v35  ;;  %v106_v53 = vld [vmem:[#allocation2 + $0x120] sm:$0xff]  ;;  %v75_v54 = vld [vmem:[#allocation2 + $0x28] sm:$0xff]  ;;  %v72_v56 = vld [vmem:[#allocation2 + $0x10] sm:$0xff] }
  0x1f   :  { %143 = vmatpush.msra.mxu0 %v82_v36  ;;  %201 = vmatpush.msra.mxu2 %v83_v38  ;;  %v107_v55 = vld [vmem:[#allocation2 + $0x128] sm:$0xff]  ;;  %v104_v57 = vld [vmem:[#allocation2 + $0x110] sm:$0xff]  ;;  %v73_v58 = vld [vmem:[#allocation2 + $0x18] sm:$0xff] }
  0x20   :  { %172 = vmatpush.msra.mxu1 %v114_v37  ;;  %230 = vmatpush.msra.mxu3 %v115_v39  ;;  %v105_v59 = vld [vmem:[#allocation2 + $0x118] sm:$0xff]  ;;  %v70_v60 = vld [vmem:[#allocation2] sm:$0xff]  ;;  %v71_v62 = vld [vmem:[#allocation2 + $0x8] sm:$0xff] }
  0x21   :  { %144 = vmatpush.msra.mxu0 %v80_v40  ;;  %202 = vmatpush.msra.mxu2 %v81_v42  ;;  %v102_v61 = vld [vmem:[#allocation2 + $0x100] sm:$0xff]  ;;  %v103_v63 = vld [vmem:[#allocation2 + $0x108] sm:$0xff]  ;;  %v281_v2 = vld [vmem:[#allocation2 + $0x2f0] sm:$0xff] }
  0x22   :  { %173 = vmatpush.msra.mxu1 %v112_v41  ;;  %231 = vmatpush.msra.mxu3 %v113_v43  ;;  %v2100_v0 = vld [vmem:[%s3142_s0] sm:$0xff]  ;;  %v2105_v1 = vld [vmem:[%s3142_s0 + $0x8] sm:$0xff]  ;;  %v313_v3 = vld [vmem:[#allocation2 + $0x3f0] sm:$0xff] }
  0x23   :  { %145 = vmatpush.msra.mxu0 %v78_v44  ;;  %203 = vmatpush.msra.mxu2 %v79_v46  ;;  %v282_v4 = vld [vmem:[#allocation2 + $0x2f8] sm:$0xff]  ;;  %v279_v6 = vld [vmem:[#allocation2 + $0x2e0] sm:$0xff]  ;;  %v280_v8 = vld [vmem:[#allocation2 + $0x2e8] sm:$0xff] }
  0x24   :  { %174 = vmatpush.msra.mxu1 %v110_v45  ;;  %232 = vmatpush.msra.mxu3 %v111_v47  ;;  %v314_v5 = vld [vmem:[#allocation2 + $0x3f8] sm:$0xff]  ;;  %v311_v7 = vld [vmem:[#allocation2 + $0x3e0] sm:$0xff]  ;;  %v312_v9 = vld [vmem:[#allocation2 + $0x3e8] sm:$0xff] }
  0x25   :  { %146 = vmatpush.msra.mxu0 %v76_v48  ;;  %204 = vmatpush.msra.mxu2 %v77_v50  ;;  %v277_v10 = vld [vmem:[#allocation2 + $0x2d0] sm:$0xff]  ;;  %v278_v12 = vld [vmem:[#allocation2 + $0x2d8] sm:$0xff]  ;;  %v275_v14 = vld [vmem:[#allocation2 + $0x2c0] sm:$0xff] }
  0x26   :  { %175 = vmatpush.msra.mxu1 %v108_v49  ;;  %233 = vmatpush.msra.mxu3 %v109_v51  ;;  %v309_v11 = vld [vmem:[#allocation2 + $0x3d0] sm:$0xff]  ;;  %v310_v13 = vld [vmem:[#allocation2 + $0x3d8] sm:$0xff]  ;;  %v307_v15 = vld [vmem:[#allocation2 + $0x3c0] sm:$0xff] }
  0x27   :  { %147 = vmatpush.msra.mxu0 %v74_v52  ;;  %205 = vmatpush.msra.mxu2 %v75_v54  ;;  %v276_v16 = vld [vmem:[#allocation2 + $0x2c8] sm:$0xff]  ;;  %v2114_v18 = vld [vmem:[%s3142_s0 + $0x10] sm:$0xff]  ;;  %v2119_v19 = vld [vmem:[%s3142_s0 + $0x18] sm:$0xff] }
  0x28   :  { %176 = vmatpush.msra.mxu1 %v106_v53  ;;  %234 = vmatpush.msra.mxu3 %v107_v55  ;;  %v308_v17 = vld [vmem:[#allocation2 + $0x3c8] sm:$0xff]  ;;  %v273_v20 = vld [vmem:[#allocation2 + $0x2b0] sm:$0xff]  ;;  %v274_v22 = vld [vmem:[#allocation2 + $0x2b8] sm:$0xff] }
  0x29   :  { %148 = vmatpush.msra.mxu0 %v72_v56  ;;  %206 = vmatpush.msra.mxu2 %v73_v58  ;;  %v305_v21 = vld [vmem:[#allocation2 + $0x3b0] sm:$0xff]  ;;  %v306_v23 = vld [vmem:[#allocation2 + $0x3b8] sm:$0xff]  ;;  %v271_v24 = vld [vmem:[#allocation2 + $0x2a0] sm:$0xff] }
  0x2a   :  { %177 = vmatpush.msra.mxu1 %v104_v57  ;;  %235 = vmatpush.msra.mxu3 %v105_v59  ;;  %v303_v25 = vld [vmem:[#allocation2 + $0x3a0] sm:$0xff]  ;;  %v272_v26 = vld [vmem:[#allocation2 + $0x2a8] sm:$0xff]  ;;  %v269_v28 = vld [vmem:[#allocation2 + $0x290] sm:$0xff] }
  0x2b   :  { %149 = vmatpush.msra.mxu0 %v70_v60  ;;  %207 = vmatpush.msra.mxu2 %v71_v62  ;;  %v304_v27 = vld [vmem:[#allocation2 + $0x3a8] sm:$0xff]  ;;  %v301_v29 = vld [vmem:[#allocation2 + $0x390] sm:$0xff]  ;;  %v270_v30 = vld [vmem:[#allocation2 + $0x298] sm:$0xff] }
  0x2c   :  { %178 = vmatpush.msra.mxu1 %v102_v61  ;;  %236 = vmatpush.msra.mxu3 %v103_v63  ;;  %v302_v31 = vld [vmem:[#allocation2 + $0x398] sm:$0xff]  ;;  %v267_v32 = vld [vmem:[#allocation2 + $0x280] sm:$0xff]  ;;  %v268_v34 = vld [vmem:[#allocation2 + $0x288] sm:$0xff] }
  0x2d   :  { %150 = vmatmul.f32.vlgmr.msra.gmra.mxu0 %v2100_v0  ;;  %179 = vmatmul.f32.vlgmr.msra.gmra.mxu1 %v2105_v1  ;;  %v299_v33 = vld [vmem:[#allocation2 + $0x380] sm:$0xff]  ;;  %v300_v35 = vld [vmem:[#allocation2 + $0x388] sm:$0xff]  ;;  %v265_v38 = vld [vmem:[#allocation2 + $0x270] sm:$0xff] }
  0x2e   :  { %208 = vmatmul.f32.vlgmr.msra.gmra.mxu2 %v2100_v0  ;;  %237 = vmatmul.f32.vlgmr.msra.gmra.mxu3 %v2105_v1  ;;  %v2128_v36 = vld [vmem:[%s3142_s0 + $0x20] sm:$0xff]  ;;  %v2133_v37 = vld [vmem:[%s3142_s0 + $0x28] sm:$0xff]  ;;  %v297_v39 = vld [vmem:[#allocation2 + $0x370] sm:$0xff] }
  0x2f   :  { %315 = vmatpush.msrb.mxu0 %v281_v2  ;;  %344 = vmatpush.msrb.mxu1 %v313_v3  ;;  %v266_v40 = vld [vmem:[#allocation2 + $0x278] sm:$0xff]  ;;  %v263_v42 = vld [vmem:[#allocation2 + $0x260] sm:$0xff]  ;;  %v264_v44 = vld [vmem:[#allocation2 + $0x268] sm:$0xff] }
  0x30   :  { %373 = vmatpush.msrb.mxu2 %v282_v4  ;;  %402 = vmatpush.msrb.mxu3 %v314_v5  ;;  %v298_v41 = vld [vmem:[#allocation2 + $0x378] sm:$0xff]  ;;  %v295_v43 = vld [vmem:[#allocation2 + $0x360] sm:$0xff]  ;;  %v296_v45 = vld [vmem:[#allocation2 + $0x368] sm:$0xff] }
  0x31   :  { %316 = vmatpush.msrb.mxu0 %v279_v6  ;;  %345 = vmatpush.msrb.mxu1 %v311_v7  ;;  %v261_v46 = vld [vmem:[#allocation2 + $0x250] sm:$0xff]  ;;  %v262_v48 = vld [vmem:[#allocation2 + $0x258] sm:$0xff]  ;;  %v259_v50 = vld [vmem:[#allocation2 + $0x240] sm:$0xff] }
  0x32   :  { %374 = vmatpush.msrb.mxu2 %v280_v8  ;;  %403 = vmatpush.msrb.mxu3 %v312_v9  ;;  %v293_v47 = vld [vmem:[#allocation2 + $0x350] sm:$0xff]  ;;  %v294_v49 = vld [vmem:[#allocation2 + $0x358] sm:$0xff]  ;;  %v291_v51 = vld [vmem:[#allocation2 + $0x340] sm:$0xff] }
  0x33   :  { %317 = vmatpush.msrb.mxu0 %v277_v10  ;;  %346 = vmatpush.msrb.mxu1 %v309_v11  ;;  %v260_v52 = vld [vmem:[#allocation2 + $0x248] sm:$0xff]  ;;  %v2142_v54 = vld [vmem:[%s3142_s0 + $0x30] sm:$0xff]  ;;  %v2147_v55 = vld [vmem:[%s3142_s0 + $0x38] sm:$0xff] }
  0x34   :  { %375 = vmatpush.msrb.mxu2 %v278_v12  ;;  %404 = vmatpush.msrb.mxu3 %v310_v13  ;;  %v292_v53 = vld [vmem:[#allocation2 + $0x348] sm:$0xff]  ;;  %v257_v56 = vld [vmem:[#allocation2 + $0x230] sm:$0xff]  ;;  %v258_v58 = vld [vmem:[#allocation2 + $0x238] sm:$0xff] }
  0x35   :  { %318 = vmatpush.msrb.mxu0 %v275_v14  ;;  %347 = vmatpush.msrb.mxu1 %v307_v15  ;;  %v289_v57 = vld [vmem:[#allocation2 + $0x330] sm:$0xff]  ;;  %v290_v59 = vld [vmem:[#allocation2 + $0x338] sm:$0xff]  ;;  %v255_v60 = vld [vmem:[#allocation2 + $0x220] sm:$0xff] }
  0x36   :  { %376 = vmatpush.msrb.mxu2 %v276_v16  ;;  %405 = vmatpush.msrb.mxu3 %v308_v17  ;;  %v287_v61 = vld [vmem:[#allocation2 + $0x320] sm:$0xff]  ;;  %v256_v62 = vld [vmem:[#allocation2 + $0x228] sm:$0xff]  ;;  %v253_v2 = vld [vmem:[#allocation2 + $0x210] sm:$0xff] }
  0x37   :  { %153 = vmatmul.f32.gmra.mxu0 %v2114_v18  ;;  %182 = vmatmul.f32.gmra.mxu1 %v2119_v19  ;;  %v288_v63 = vld [vmem:[#allocation2 + $0x328] sm:$0xff]  ;;  %v285_v3 = vld [vmem:[#allocation2 + $0x310] sm:$0xff]  ;;  %v254_v4 = vld [vmem:[#allocation2 + $0x218] sm:$0xff] }
  0x38   :  { %211 = vmatmul.f32.gmra.mxu2 %v2114_v18  ;;  %240 = vmatmul.f32.gmra.mxu3 %v2119_v19  ;;  %v286_v5 = vld [vmem:[#allocation2 + $0x318] sm:$0xff]  ;;  %v251_v6 = vld [vmem:[#allocation2 + $0x200] sm:$0xff]  ;;  %v252_v8 = vld [vmem:[#allocation2 + $0x208] sm:$0xff] }
  0x39   :  { %319 = vmatpush.msrb.mxu0 %v273_v20  ;;  %348 = vmatpush.msrb.mxu1 %v305_v21  ;;  %v283_v7 = vld [vmem:[#allocation2 + $0x300] sm:$0xff]  ;;  %v284_v9 = vld [vmem:[#allocation2 + $0x308] sm:$0xff]  ;;  %v462_v10 = vld [vmem:[#allocation2 + $0x4f0] sm:$0xff] }
  0x3a   :  { %377 = vmatpush.msrb.mxu2 %v274_v22  ;;  %406 = vmatpush.msrb.mxu3 %v306_v23  ;;  %v494_v11 = vld [vmem:[#allocation2 + $0x5f0] sm:$0xff]  ;;  %v463_v12 = vld [vmem:[#allocation2 + $0x4f8] sm:$0xff]  ;;  %v460_v14 = vld [vmem:[#allocation2 + $0x4e0] sm:$0xff] }
  0x3b   :  { %320 = vmatpush.msrb.mxu0 %v271_v24  ;;  %349 = vmatpush.msrb.mxu1 %v303_v25  ;;  %v495_v13 = vld [vmem:[#allocation2 + $0x5f8] sm:$0xff]  ;;  %v492_v15 = vld [vmem:[#allocation2 + $0x5e0] sm:$0xff]  ;;  %v461_v16 = vld [vmem:[#allocation2 + $0x4e8] sm:$0xff] }
  0x3c   :  { %378 = vmatpush.msrb.mxu2 %v272_v26  ;;  %407 = vmatpush.msrb.mxu3 %v304_v27  ;;  %v493_v17 = vld [vmem:[#allocation2 + $0x5e8] sm:$0xff]  ;;  %v458_v20 = vld [vmem:[#allocation2 + $0x4d0] sm:$0xff]  ;;  %v459_v22 = vld [vmem:[#allocation2 + $0x4d8] sm:$0xff] }
  0x3d   :  { %321 = vmatpush.msrb.mxu0 %v269_v28  ;;  %350 = vmatpush.msrb.mxu1 %v301_v29  ;;  %v490_v21 = vld [vmem:[#allocation2 + $0x5d0] sm:$0xff]  ;;  %v491_v23 = vld [vmem:[#allocation2 + $0x5d8] sm:$0xff]  ;;  %v456_v24 = vld [vmem:[#allocation2 + $0x4c0] sm:$0xff] }
  0x3e   :  { %379 = vmatpush.msrb.mxu2 %v270_v30  ;;  %408 = vmatpush.msrb.mxu3 %v302_v31  ;;  %v488_v25 = vld [vmem:[#allocation2 + $0x5c0] sm:$0xff]  ;;  %v457_v26 = vld [vmem:[#allocation2 + $0x4c8] sm:$0xff]  ;;  %v454_v28 = vld [vmem:[#allocation2 + $0x4b0] sm:$0xff] }
  0x3f   :  { %322 = vmatpush.msrb.mxu0 %v267_v32  ;;  %351 = vmatpush.msrb.mxu1 %v299_v33  ;;  %v489_v27 = vld [vmem:[#allocation2 + $0x5c8] sm:$0xff]  ;;  %v486_v29 = vld [vmem:[#allocation2 + $0x5b0] sm:$0xff]  ;;  %v455_v30 = vld [vmem:[#allocation2 + $0x4b8] sm:$0xff] }
  0x40   :  { %380 = vmatpush.msrb.mxu2 %v268_v34  ;;  %409 = vmatpush.msrb.mxu3 %v300_v35  ;;  %v487_v31 = vld [vmem:[#allocation2 + $0x5b8] sm:$0xff]  ;;  %v452_v32 = vld [vmem:[#allocation2 + $0x4a0] sm:$0xff]  ;;  %v453_v34 = vld [vmem:[#allocation2 + $0x4a8] sm:$0xff] }
  0x41   :  { %156 = vmatmul.f32.gmra.mxu0 %v2128_v36  ;;  %185 = vmatmul.f32.gmra.mxu1 %v2133_v37  ;;  %v484_v33 = vld [vmem:[#allocation2 + $0x5a0] sm:$0xff]  ;;  %v485_v35 = vld [vmem:[#allocation2 + $0x5a8] sm:$0xff] }
  0x42   :  { %214 = vmatmul.f32.gmra.mxu2 %v2128_v36  ;;  %243 = vmatmul.f32.gmra.mxu3 %v2133_v37 }
  0x43   :  { %323 = vmatpush.msrb.mxu0 %v265_v38  ;;  %352 = vmatpush.msrb.mxu1 %v297_v39  ;;  %v450_v38 = vld [vmem:[#allocation2 + $0x490] sm:$0xff] }
  0x44   :  { %381 = vmatpush.msrb.mxu2 %v266_v40  ;;  %410 = vmatpush.msrb.mxu3 %v298_v41  ;;  %v482_v39 = vld [vmem:[#allocation2 + $0x590] sm:$0xff]  ;;  %v451_v40 = vld [vmem:[#allocation2 + $0x498] sm:$0xff] }
  0x45   :  { %324 = vmatpush.msrb.mxu0 %v263_v42  ;;  %353 = vmatpush.msrb.mxu1 %v295_v43  ;;  %v483_v41 = vld [vmem:[#allocation2 + $0x598] sm:$0xff]  ;;  %v448_v42 = vld [vmem:[#allocation2 + $0x480] sm:$0xff] }
  0x46   :  { %382 = vmatpush.msrb.mxu2 %v264_v44  ;;  %411 = vmatpush.msrb.mxu3 %v296_v45  ;;  %v480_v43 = vld [vmem:[#allocation2 + $0x580] sm:$0xff]  ;;  %v449_v44 = vld [vmem:[#allocation2 + $0x488] sm:$0xff] }
  0x47   :  { %325 = vmatpush.msrb.mxu0 %v261_v46  ;;  %354 = vmatpush.msrb.mxu1 %v293_v47  ;;  %v481_v45 = vld [vmem:[#allocation2 + $0x588] sm:$0xff]  ;;  %v446_v46 = vld [vmem:[#allocation2 + $0x470] sm:$0xff] }
  0x48   :  { %383 = vmatpush.msrb.mxu2 %v262_v48  ;;  %412 = vmatpush.msrb.mxu3 %v294_v49  ;;  %v478_v47 = vld [vmem:[#allocation2 + $0x570] sm:$0xff]  ;;  %v447_v48 = vld [vmem:[#allocation2 + $0x478] sm:$0xff] }
  0x49   :  { %326 = vmatpush.msrb.mxu0 %v259_v50  ;;  %355 = vmatpush.msrb.mxu1 %v291_v51  ;;  %v479_v49 = vld [vmem:[#allocation2 + $0x578] sm:$0xff]  ;;  %v444_v50 = vld [vmem:[#allocation2 + $0x460] sm:$0xff] }
  0x4a   :  { %384 = vmatpush.msrb.mxu2 %v260_v52  ;;  %413 = vmatpush.msrb.mxu3 %v292_v53  ;;  %v476_v51 = vld [vmem:[#allocation2 + $0x560] sm:$0xff]  ;;  %v445_v52 = vld [vmem:[#allocation2 + $0x468] sm:$0xff] }
  0x4b   :  { %159 = vmatmul.f32.gmra.mxu0 %v2142_v54  ;;  %188 = vmatmul.f32.gmra.mxu1 %v2147_v55  ;;  %v477_v53 = vld [vmem:[#allocation2 + $0x568] sm:$0xff] }
  0x4c   :  { %217 = vmatmul.f32.gmra.mxu2 %v2142_v54  ;;  %246 = vmatmul.f32.gmra.mxu3 %v2147_v55 }
  0x4d   :  { %327 = vmatpush.msrb.mxu0 %v257_v56  ;;  %356 = vmatpush.msrb.mxu1 %v289_v57  ;;  %v442_v56 = vld [vmem:[#allocation2 + $0x450] sm:$0xff] }
  0x4e   :  { %385 = vmatpush.msrb.mxu2 %v258_v58  ;;  %414 = vmatpush.msrb.mxu3 %v290_v59  ;;  %v474_v57 = vld [vmem:[#allocation2 + $0x550] sm:$0xff]  ;;  %v443_v58 = vld [vmem:[#allocation2 + $0x458] sm:$0xff] }
  0x4f   :  { %328 = vmatpush.msrb.mxu0 %v255_v60  ;;  %357 = vmatpush.msrb.mxu1 %v287_v61  ;;  %v475_v59 = vld [vmem:[#allocation2 + $0x558] sm:$0xff]  ;;  %v440_v60 = vld [vmem:[#allocation2 + $0x440] sm:$0xff] }
  0x50   :  { %386 = vmatpush.msrb.mxu2 %v256_v62  ;;  %415 = vmatpush.msrb.mxu3 %v288_v63  ;;  %v472_v61 = vld [vmem:[#allocation2 + $0x540] sm:$0xff]  ;;  %v441_v62 = vld [vmem:[#allocation2 + $0x448] sm:$0xff] }
  0x51   :  { %329 = vmatpush.msrb.mxu0 %v253_v2  ;;  %358 = vmatpush.msrb.mxu1 %v285_v3  ;;  %v473_v63 = vld [vmem:[#allocation2 + $0x548] sm:$0xff]  ;;  %v438_v2 = vld [vmem:[#allocation2 + $0x430] sm:$0xff] }
  0x52   :  { %387 = vmatpush.msrb.mxu2 %v254_v4  ;;  %416 = vmatpush.msrb.mxu3 %v286_v5  ;;  %v470_v3 = vld [vmem:[#allocation2 + $0x530] sm:$0xff]  ;;  %v439_v4 = vld [vmem:[#allocation2 + $0x438] sm:$0xff] }
  0x53   :  { %330 = vmatpush.msrb.mxu0 %v251_v6  ;;  %359 = vmatpush.msrb.mxu1 %v283_v7  ;;  %v471_v5 = vld [vmem:[#allocation2 + $0x538] sm:$0xff]  ;;  %v436_v6 = vld [vmem:[#allocation2 + $0x420] sm:$0xff] }
  0x54   :  { %388 = vmatpush.msrb.mxu2 %v252_v8  ;;  %417 = vmatpush.msrb.mxu3 %v284_v9  ;;  %v468_v7 = vld [vmem:[#allocation2 + $0x520] sm:$0xff]  ;;  %v437_v8 = vld [vmem:[#allocation2 + $0x428] sm:$0xff] }
  0x55   :  { %331 = vmatmul.f32.vlgmr.msrb.gmra.mxu0 %v2100_v0  ;;  %360 = vmatmul.f32.vlgmr.msrb.gmra.mxu1 %v2105_v1  ;;  %v469_v9 = vld [vmem:[#allocation2 + $0x528] sm:$0xff] }
  0x56   :  { %389 = vmatmul.f32.vlgmr.msrb.gmra.mxu2 %v2100_v0  ;;  %418 = vmatmul.f32.vlgmr.msrb.gmra.mxu3 %v2105_v1 }
  0x57   :  { %496 = vmatpush.msra.mxu0 %v462_v10  ;;  %525 = vmatpush.msra.mxu1 %v494_v11  ;;  %v434_v10 = vld [vmem:[#allocation2 + $0x410] sm:$0xff] }
  0x58   :  { %554 = vmatpush.msra.mxu2 %v463_v12  ;;  %583 = vmatpush.msra.mxu3 %v495_v13  ;;  %v466_v11 = vld [vmem:[#allocation2 + $0x510] sm:$0xff]  ;;  %v435_v12 = vld [vmem:[#allocation2 + $0x418] sm:$0xff] }
  0x59   :  { %497 = vmatpush.msra.mxu0 %v460_v14  ;;  %526 = vmatpush.msra.mxu1 %v492_v15  ;;  %v467_v13 = vld [vmem:[#allocation2 + $0x518] sm:$0xff]  ;;  %v432_v14 = vld [vmem:[#allocation2 + $0x400] sm:$0xff] }
  0x5a   :  { %555 = vmatpush.msra.mxu2 %v461_v16  ;;  %584 = vmatpush.msra.mxu3 %v493_v17  ;;  %v464_v15 = vld [vmem:[#allocation2 + $0x500] sm:$0xff]  ;;  %v433_v16 = vld [vmem:[#allocation2 + $0x408] sm:$0xff] }
  0x5b   :  { %498 = vmatpush.msra.mxu0 %v458_v20  ;;  %527 = vmatpush.msra.mxu1 %v490_v21  ;;  %v465_v17 = vld [vmem:[#allocation2 + $0x508] sm:$0xff] }
  0x5c   :  { %556 = vmatpush.msra.mxu2 %v459_v22  ;;  %585 = vmatpush.msra.mxu3 %v491_v23 }
  0x5d   :  { %499 = vmatpush.msra.mxu0 %v456_v24  ;;  %528 = vmatpush.msra.mxu1 %v488_v25 }
  0x5e   :  { %557 = vmatpush.msra.mxu2 %v457_v26  ;;  %586 = vmatpush.msra.mxu3 %v489_v27 }
  0x5f   :  { %334 = vmatmul.f32.gmra.mxu0 %v2114_v18  ;;  %363 = vmatmul.f32.gmra.mxu1 %v2119_v19 }
  0x60   :  { %392 = vmatmul.f32.gmra.mxu2 %v2114_v18  ;;  %421 = vmatmul.f32.gmra.mxu3 %v2119_v19 }
  0x61   :  { %500 = vmatpush.msra.mxu0 %v454_v28  ;;  %529 = vmatpush.msra.mxu1 %v486_v29 }
  0x62   :  { %558 = vmatpush.msra.mxu2 %v455_v30  ;;  %587 = vmatpush.msra.mxu3 %v487_v31 }
  0x63   :  { %501 = vmatpush.msra.mxu0 %v452_v32  ;;  %530 = vmatpush.msra.mxu1 %v484_v33 }
  0x64   :  { %559 = vmatpush.msra.mxu2 %v453_v34  ;;  %588 = vmatpush.msra.mxu3 %v485_v35 }
  0x65   :  { %502 = vmatpush.msra.mxu0 %v450_v38  ;;  %531 = vmatpush.msra.mxu1 %v482_v39 }
  0x66   :  { %560 = vmatpush.msra.mxu2 %v451_v40  ;;  %589 = vmatpush.msra.mxu3 %v483_v41 }
  0x67   :  { %503 = vmatpush.msra.mxu0 %v448_v42  ;;  %532 = vmatpush.msra.mxu1 %v480_v43 }
  0x68   :  { %561 = vmatpush.msra.mxu2 %v449_v44  ;;  %590 = vmatpush.msra.mxu3 %v481_v45 }
  0x69   :  { %337 = vmatmul.f32.gmra.mxu0 %v2128_v36  ;;  %366 = vmatmul.f32.gmra.mxu1 %v2133_v37 }
  0x6a   :  { %395 = vmatmul.f32.gmra.mxu2 %v2128_v36  ;;  %424 = vmatmul.f32.gmra.mxu3 %v2133_v37 }
  0x6b   :  { %504 = vmatpush.msra.mxu0 %v446_v46  ;;  %533 = vmatpush.msra.mxu1 %v478_v47 }
  0x6c   :  { %562 = vmatpush.msra.mxu2 %v447_v48  ;;  %591 = vmatpush.msra.mxu3 %v479_v49 }
  0x6d   :  { %505 = vmatpush.msra.mxu0 %v444_v50  ;;  %534 = vmatpush.msra.mxu1 %v476_v51 }
  0x6e   :  { %563 = vmatpush.msra.mxu2 %v445_v52  ;;  %592 = vmatpush.msra.mxu3 %v477_v53 }
  0x6f   :  { %506 = vmatpush.msra.mxu0 %v442_v56  ;;  %535 = vmatpush.msra.mxu1 %v474_v57 }
  0x70   :  { %564 = vmatpush.msra.mxu2 %v443_v58  ;;  %593 = vmatpush.msra.mxu3 %v475_v59 }
  0x71   :  { %507 = vmatpush.msra.mxu0 %v440_v60  ;;  %536 = vmatpush.msra.mxu1 %v472_v61 }
  0x72   :  { %565 = vmatpush.msra.mxu2 %v441_v62  ;;  %594 = vmatpush.msra.mxu3 %v473_v63 }
  0x73   :  { %340 = vmatmul.f32.gmra.mxu0 %v2142_v54  ;;  %369 = vmatmul.f32.gmra.mxu1 %v2147_v55 }
  0x74   :  { %398 = vmatmul.f32.gmra.mxu2 %v2142_v54  ;;  %427 = vmatmul.f32.gmra.mxu3 %v2147_v55 }
  0x75   :  { %508 = vmatpush.msra.mxu0 %v438_v2  ;;  %537 = vmatpush.msra.mxu1 %v470_v3  ;;  %v2034_v2 = vmov 0   ;;  %v687_v3 = vld [vmem:[%s3145_s3] sm:$0xff] }
  0x76   :  { %566 = vmatpush.msra.mxu2 %v439_v4  ;;  %595 = vmatpush.msra.mxu3 %v471_v5 }
  0x77   :  { %509 = vmatpush.msra.mxu0 %v436_v6  ;;  %538 = vmatpush.msra.mxu1 %v468_v7 }
  0x78   :  { %567 = vmatpush.msra.mxu2 %v437_v8  ;;  %596 = vmatpush.msra.mxu3 %v469_v9  ;;  %v688_v8 = vld [vmem:[%s3145_s3 + $0x8] sm:$0xff] }
  0x79   :  { %510 = vmatpush.msra.mxu0 %v434_v10  ;;  %539 = vmatpush.msra.mxu1 %v466_v11 }
  0x7a   :  { %568 = vmatpush.msra.mxu2 %v435_v12  ;;  %597 = vmatpush.msra.mxu3 %v467_v13 }
  0x7b   :  { %511 = vmatpush.msra.mxu0 %v432_v14  ;;  %540 = vmatpush.msra.mxu1 %v464_v15 }
  0x7c   :  { %569 = vmatpush.msra.mxu2 %v433_v16  ;;  %598 = vmatpush.msra.mxu3 %v465_v17  ;;  %v721_v16 = vld [vmem:[%s3146_s4 + $0x10] sm:$0xff] }
  0x7d   :  { %512 = vmatmul.f32.vlgmr.msra.gmra.mxu0 %v2100_v0  ;;  %541 = vmatmul.f32.vlgmr.msra.gmra.mxu1 %v2105_v1 }
  0x7e   :  { %570 = vmatmul.f32.vlgmr.msra.gmra.mxu2 %v2100_v0  ;;  %599 = vmatmul.f32.vlgmr.msra.gmra.mxu3 %v2105_v1 }
  0x7f   :  { %1589 = vset.pattern.permute.xlu0 %v2034_v2  ;;  %1590 = vset.pattern.permute.xlu1 %v2034_v2 }
  0x80   :  { %693 = vperm.xlu0 %1589, %v687_v3   ;;  %1591 = vset.pattern.permute.xlu2 %v2034_v2 }
  0x85   :  { %515 = vmatmul.f32.gmra.mxu0 %v2114_v18  ;;  %544 = vmatmul.f32.gmra.mxu1 %v2119_v19 }
  0x86   :  { %573 = vmatmul.f32.gmra.mxu2 %v2114_v18  ;;  %602 = vmatmul.f32.gmra.mxu3 %v2119_v19 }
  0x88   :  { %698 = vperm.xlu0 %1589, %v688_v8  }
  0x8d   :  { %518 = vmatmul.f32.gmra.mxu0 %v2128_v36  ;;  %547 = vmatmul.f32.gmra.mxu1 %v2133_v37 }
  0x8e   :  { %576 = vmatmul.f32.gmra.mxu2 %v2128_v36  ;;  %605 = vmatmul.f32.gmra.mxu3 %v2133_v37 }
  0x90   :  { %735 = vperm.xlu0 %1589, %v721_v16  }
  0x95   :  { %521 = vmatmul.f32.gmra.mxu0 %v2142_v54  ;;  %550 = vmatmul.f32.gmra.mxu1 %v2147_v55 }
  0x96   :  { %579 = vmatmul.f32.gmra.mxu2 %v2142_v54  ;;  %608 = vmatmul.f32.gmra.mxu3 %v2147_v55 }
  0xaa   :  { %v151_v0 = vpop.f32.mrf.mxu0  ;;  %v180_v1 = vpop.f32.mrf.mxu1 }
  0xab   :  { %v2185_v18 = vadd.f32 %v180_v1, %v151_v0 }
  0xb1   :  { %v209_v19 = vpop.f32.mrf.mxu2  ;;  %v238_v20 = vpop.f32.mrf.mxu3 }
  0xb2   :  { %v2187_v21 = vadd.f32 %v238_v20, %v209_v19 }
  0xb4   :  { %v154_v22 = vpop.f32.mrf.mxu0  ;;  %v183_v36 = vpop.f32.mrf.mxu1 }
  0xb5   :  { %v2189_v23 = vadd.f32 %v183_v36, %v154_v22  ;;  %v689_v36 = vld [vmem:[%s3145_s3 + $0x10] sm:$0xff] }
  0xb6   :  { %703 = vperm.xlu1 %1590, %v689_v36  }
  0xbb   :  { %v212_v37 = vpop.f32.mrf.mxu2  ;;  %v241_v24 = vpop.f32.mrf.mxu3 }
  0xbc   :  { %v2191_v25 = vadd.f32 %v241_v24, %v212_v37 }
  0xbe   :  { %v157_v26 = vpop.f32.mrf.mxu0  ;;  %v186_v54 = vpop.f32.mrf.mxu1 }
  0xbf   :  { %v2193_v27 = vadd.f32 %v186_v54, %v157_v26 }
  0xc5   :  { %v215_v55 = vpop.f32.mrf.mxu2  ;;  %v244_v28 = vpop.f32.mrf.mxu3 }
  0xc6   :  { %v2195_v29 = vadd.f32 %v244_v28, %v215_v55 }
  0xc8   :  { %v160_v30 = vpop.f32.mrf.mxu0  ;;  %v189_v31 = vpop.f32.mrf.mxu1 }
  0xc9   :  { %v2197_v32 = vadd.f32 %v189_v31, %v160_v30  ;;  %v690_v30 = vld [vmem:[%s3145_s3 + $0x18] sm:$0xff]  ;;  %v719_v31 = vld [vmem:[%s3146_s4] sm:$0xff] }
  0xca   :  { %708 = vperm.xlu1 %1590, %v690_v30   ;;  %725 = vperm.xlu2 %1591, %v719_v31  }
  0xcf   :  { %v218_v33 = vpop.f32.mrf.mxu2  ;;  %v247_v34 = vpop.f32.mrf.mxu3 }
  0xd0   :  { %v2199_v35 = vadd.f32 %v247_v34, %v218_v33  ;;  %v612_v34 = vld [vmem:[%s3144_s2] sm:$0xff] }
  0xd2   :  { %v332_v38 = vpop.f32.mrf.mxu0  ;;  %v361_v39 = vpop.f32.mrf.mxu1 }
  0xd3   :  { %v2201_v40 = vadd.f32 %v361_v39, %v332_v38 }
  0xd9   :  { %v390_v41 = vpop.f32.mrf.mxu2  ;;  %v419_v42 = vpop.f32.mrf.mxu3 }
  0xda   :  { %v2203_v43 = vadd.f32 %v419_v42, %v390_v41  ;;  %v2035_v42 = vmov 0.0  }
  0xdc   :  { %v335_v44 = vpop.f32.mrf.mxu0  ;;  %v364_v45 = vpop.f32.mrf.mxu1 }
  0xdd   :  { %v365_v26 = vadd.f32 %v364_v45, %v335_v44 }
  0xe3   :  { %v2205_v46 = vpop.f32.mrf.mxu2  ;;  %v2207_v47 = vpop.f32.mrf.mxu3 }
  0xe4   :  { %v423_v33 = vadd.f32 %v2207_v47, %v2205_v46 }
  0xe6   :  { %v338_v48 = vpop.f32.mrf.mxu0  ;;  %v367_v49 = vpop.f32.mrf.mxu1 }
  0xe7   :  { %v368_v37 = vadd.f32 %v367_v49, %v338_v48 }
  0xed   :  { %v396_v50 = vpop.f32.mrf.mxu2  ;;  %v425_v51 = vpop.f32.mrf.mxu3 }
  0xee   :  { %v426_v28 = vadd.f32 %v425_v51, %v396_v50 }
  0xf0   :  { %v341_v52 = vpop.f32.mrf.mxu0  ;;  %v370_v53 = vpop.f32.mrf.mxu1 }
  0xf1   :  { %v371_v20 = vadd.f32 %v370_v53, %v341_v52 }
  0xf7   :  { %v399_v56 = vpop.f32.mrf.mxu2  ;;  %v428_v57 = vpop.f32.mrf.mxu3 }
  0xf8   :  { %v429_v55 = vadd.f32 %v428_v57, %v399_v56 }
  0xfa   :  { %v513_v58 = vpop.f32.mrf.mxu0  ;;  %v542_v59 = vpop.f32.mrf.mxu1 }
  0xfb   :  { %v543_v17 = vadd.f32 %v542_v59, %v513_v58 }
 0x101   :  { %v571_v60 = vpop.f32.mrf.mxu2  ;;  %v600_v61 = vpop.f32.mrf.mxu3 }
 0x102   :  { %v516_v62 = vpop.f32.mrf.mxu0  ;;  %v545_v63 = vpop.f32.mrf.mxu1  ;;  %v601_v54 = vadd.f32 %v600_v61, %v571_v60 }
 0x103   :  { %v546_v15 = vadd.f32 %v545_v63, %v516_v62 }
 0x109   :  { %v574_v4 = vpop.f32.mrf.mxu2  ;;  %v603_v5 = vpop.f32.mrf.mxu3 }
 0x10a   :  { %v519_v6 = vpop.f32.mrf.mxu0  ;;  %v548_v7 = vpop.f32.mrf.mxu1  ;;  %v604_v24 = vadd.f32 %v603_v5, %v574_v4 }
 0x10b   :  { %v549_v14 = vadd.f32 %v548_v7, %v519_v6 }
 0x111   :  { %v577_v9 = vpop.f32.mrf.mxu2  ;;  %v606_v10 = vpop.f32.mrf.mxu3 }
 0x112   :  { %v522_v11 = vpop.f32.mrf.mxu0  ;;  %v551_v12 = vpop.f32.mrf.mxu1  ;;  %v607_v22 = vadd.f32 %v606_v10, %v577_v9 }
 0x113   :  { %v552_v13 = vadd.f32 %v551_v12, %v522_v11 }
 0x115   :  { %633 = vmatpush.msrb.mxu0 %v552_v13 }
 0x117   :  { %634 = vmatpush.msrb.mxu0 %v549_v14 }
 0x119   :  { %v580_v0 = vpop.f32.mrf.mxu2  ;;  %v609_v1 = vpop.f32.mrf.mxu3  ;;  %635 = vmatpush.msrb.mxu0 %v546_v15 }
 0x11a   :  { %v610_v19 = vadd.f32 %v609_v1, %v580_v0 }
 0x11b   :  { %636 = vmatpush.msrb.mxu0 %v543_v17 }
 0x11c   :  { %662 = vmatpush.msrb.mxu1 %v610_v19 }
 0x11d   :  { %637 = vmatpush.msrb.mxu0 %v371_v20 }
 0x11e   :  { %663 = vmatpush.msrb.mxu1 %v607_v22 }
 0x11f   :  { %638 = vmatpush.msrb.mxu0 %v368_v37 }
 0x120   :  { %664 = vmatpush.msrb.mxu1 %v604_v24 }
 0x121   :  { %639 = vmatpush.msrb.mxu0 %v365_v26 }
 0x122   :  { %665 = vmatpush.msrb.mxu1 %v601_v54 }
 0x123   :  { %640 = vmatpush.msrb.mxu0 %v2201_v40 }
 0x124   :  { %666 = vmatpush.msrb.mxu1 %v429_v55  ;;  %v726_v38 = vpop.permute.xlu2 %725 }
 0x125   :  { %641 = vmatpush.msrb.mxu0 %v2197_v32  ;;  %v722_v32 = vld [vmem:[%s3146_s4 + $0x18] sm:$0xff] }
 0x126   :  { %667 = vmatpush.msrb.mxu1 %v426_v28  ;;  %740 = vperm.xlu1 %1590, %v722_v32  }
 0x127   :  { %642 = vmatpush.msrb.mxu0 %v2193_v27  ;;  %v720_v27 = vld [vmem:[%s3146_s4 + $0x8] sm:$0xff] }
 0x128   :  { %668 = vmatpush.msrb.mxu1 %v423_v33  ;;  %730 = vperm.xlu2 %1591, %v720_v27   ;;  %v704_v59 = vpop.permute.xlu1 %703 }
 0x129   :  { %643 = vmatpush.msrb.mxu0 %v2189_v23  ;;  %v613_v23 = vld [vmem:[%s3144_s2 + $0x8] sm:$0xff] }
 0x12a   :  { %669 = vmatpush.msrb.mxu1 %v2203_v43 }
 0x12b   :  { %644 = vmatpush.msrb.mxu0 %v2185_v18  ;;  %v614_v18 = vld [vmem:[%s3144_s2 + $0x10] sm:$0xff] }
 0x12c   :  { %670 = vmatpush.msrb.mxu1 %v2199_v35  ;;  %1558 = vmatmul.msk.f32.vlgmr.msrb.gmra.mxu0 %vm616_vm0, %v612_v34 }
 0x12e   :  { %671 = vmatpush.msrb.mxu1 %v2195_v29 }
 0x130   :  { %672 = vmatpush.msrb.mxu1 %v2191_v25  ;;  %v615_v25 = vld [vmem:[%s3144_s2 + $0x18] sm:$0xff]  ;;  %s2037_s2 = smov 96  }
 0x132   :  { %673 = vmatpush.msrb.mxu1 %v2187_v21  ;;  %v694_v21 = vpop.permute.xlu0 %693 }
 0x133   :  { %1562 = vmatmul.msk.f32.vlgmr.msrb.gmra.mxu1 %vm616_vm0, %v612_v34 }
 0x134   :  { %1559 = vmatmul.msk.f32.gmra.mxu0 %vm616_vm0, %v613_v23 }
 0x13a   :  { %v699_v46 = vpop.permute.xlu0 %698 }
 0x13b   :  { %1563 = vmatmul.msk.f32.gmra.mxu1 %vm616_vm0, %v613_v23 }
 0x13c   :  { %1560 = vmatmul.msk.f32.gmra.mxu0 %vm616_vm0, %v614_v18  ;;  %v709_v9 = vpop.permute.xlu1 %708 }
 0x142   :  { %v736_v62 = vpop.permute.xlu0 %735 }
 0x143   :  { %1564 = vmatmul.msk.f32.gmra.mxu1 %vm616_vm0, %v614_v18 }
 0x144   :  { %1561 = vmatmul.msk.f32.gmra.mxu0 %vm616_vm0, %v615_v25 }
 0x14b   :  { %1565 = vmatmul.msk.f32.gmra.mxu1 %vm616_vm0, %v615_v25 }
 0x182   :  { %v731_v50 = vpop.permute.xlu2 %730 }
 0x198   :  { %v741_v15 = vpop.permute.xlu1 %740 }
 0x1a9   :  { %v646_v29 = vpop.f32.mrf.mxu0 }
 0x1aa   :  { %v711_v35 = vmul.f32 %v694_v21, %v646_v29 }
 0x1ac   :  { %v743_v39 = vadd.f32 %v726_v38, %v711_v35 }
 0x1ae   :  { %v751_v40 = vmax.f32 %v743_v39, 0.0 }
 0x1b0   :  { %v675_v41 = vpop.f32.mrf.mxu1  ;;  %v1602_v43 = vpack.i.bf16 %v751_v40, %v2035_v42 }
 0x1b1   :  { %v712_v44 = vmul.f32 %v694_v21, %v675_v41  ;;  %v649_v45 = vpop.f32.mrf.mxu0 }
 0x1b2   :  { %1603 = vrot.lane.b32.xlu0 %v1602_v43, %s2036_s11  ;;  %1598 = vrot.lane.b32.xlu1 %v1602_v43, %s2037_s2  ;;  %v713_v48 = vmul.f32 %v699_v46, %v649_v45 }
 0x1b3   :  { %v744_v47 = vadd.f32 %v726_v38, %v712_v44  ;;  %1593 = vrot.lane.b32.xlu2 %v1602_v43, %s2038_s12 }
 0x1b4   :  { %v745_v51 = vadd.f32 %v731_v50, %v713_v48 }
 0x1b5   :  { %v752_v49 = vmax.f32 %v744_v47, 0.0 }
 0x1b6   :  { %v753_v53 = vmax.f32 %v745_v51, 0.0 }
 0x1b7   :  { %v1612_v52 = vpack.i.bf16 %v752_v49, %v751_v40 }
 0x1b8   :  { %v1637_v56 = vpack.i.bf16 %v753_v53, %v752_v49  ;;  %v678_v57 = vpop.f32.mrf.mxu1  ;;  %v1642_v3 = vpack.i.bf16 %v753_v53, %v2035_v42 }
 0x1b9   :  { %v652_v58 = vpop.f32.mrf.mxu0  ;;  %v714_v60 = vmul.f32 %v699_v46, %v678_v57 }
 0x1ba   :  { %1613 = vrot.lane.b32.xlu0 %v1612_v52, %s2039_s15  ;;  %1623 = vrot.lane.b32.xlu1 %v1612_v52, %s2030_s14  ;;  %v715_v61 = vmul.f32 %v704_v59, %v652_v58 }
 0x1bb   :  { %1608 = vrot.lane.b32.xlu2 %v1612_v52, %s2040_s16  ;;  %v746_v63 = vadd.f32 %v731_v50, %v714_v60 }
 0x1bc   :  { %v747_v2 = vadd.f32 %v736_v62, %v715_v61 }
 0x1bd   :  { %v754_v4 = vmax.f32 %v746_v63, 0.0 }
 0x1be   :  { %v755_v5 = vmax.f32 %v747_v2, 0.0 }
 0x1bf   :  { %v1657_v6 = vpack.i.bf16 %v754_v4, %v753_v53 }
 0x1c0   :  { %v1662_v7 = vpack.i.bf16 %v755_v5, %v754_v4  ;;  %v681_v8 = vpop.f32.mrf.mxu1 }
 0x1c1   :  { %v716_v10 = vmul.f32 %v704_v59, %v681_v8  ;;  %v655_v12 = vpop.f32.mrf.mxu0 }
 0x1c2   :  { %1638 = vrot.lane.b32.xlu1 %v1637_v56, %s2036_s11  ;;  %1628 = vrot.lane.b32.xlu0 %v1637_v56, %s2038_s12  ;;  %v717_v14 = vmul.f32 %v709_v9, %v655_v12 }
 0x1c3   :  { %1618 = vrot.lane.b32.xlu2 %v1612_v52, %s2041_s17  ;;  %v748_v11 = vadd.f32 %v736_v62, %v716_v10 }
 0x1c4   :  { %v749_v16 = vadd.f32 %v741_v15, %v717_v14 }
 0x1c5   :  { %v756_v13 = vmax.f32 %v748_v11, 0.0 }
 0x1c6   :  { %v757_v0 = vmax.f32 %v749_v16, 0.0 }
 0x1c7   :  { %v1692_v17 = vpack.i.bf16 %v756_v13, %v755_v5 }
 0x1c8   :  { %v1707_v1 = vpack.i.bf16 %v757_v0, %v756_v13  ;;  %v684_v19 = vpop.f32.mrf.mxu1 }
 0x1c9   :  { %v718_v20 = vmul.f32 %v709_v9, %v684_v19 }
 0x1ca   :  { %1643 = vrot.lane.b32.xlu1 %v1642_v3, %s2039_s15  ;;  %1648 = vrot.lane.b32.xlu0 %v1642_v3, %s2041_s17 }
 0x1cb   :  { %1633 = vrot.lane.b32.xlu2 %v1637_v56, %s2037_s2  ;;  %v750_v22 = vadd.f32 %v741_v15, %v718_v20 }
 0x1cd   :  { %v758_v36 = vmax.f32 %v750_v22, 0.0 }
 0x1cf   :  { %v1727_v37 = vpack.i.bf16 %v758_v36, %v757_v0 }
 0x1d2   :  { %1658 = vrot.lane.b32.xlu0 %v1657_v6, %s2040_s16  ;;  %1663 = vrot.lane.b32.xlu1 %v1662_v7, %s2038_s12 }
 0x1d3   :  { %1653 = vrot.lane.b32.xlu2 %v1642_v3, %s2030_s14 }
 0x1da   :  { %1668 = vrot.lane.b32.xlu0 %v1662_v7, %s2037_s2  ;;  %1683 = vrot.lane.b32.xlu1 %v1662_v7, %s2041_s17 }
 0x1db   :  { %1673 = vrot.lane.b32.xlu2 %v1662_v7, %s2036_s11 }
 0x1e2   :  { %1688 = vrot.lane.b32.xlu0 %v1662_v7, %s2030_s14  ;;  %1693 = vrot.lane.b32.xlu1 %v1692_v17, %s2040_s16 }
 0x1e3   :  { %1678 = vrot.lane.b32.xlu2 %v1662_v7, %s2039_s15 }
 0x1ea   :  { %1708 = vrot.lane.b32.xlu0 %v1707_v1, %s2036_s11  ;;  %1703 = vrot.lane.b32.xlu1 %v1707_v1, %s2037_s2 }
 0x1eb   :  { %1698 = vrot.lane.b32.xlu2 %v1707_v1, %s2038_s12 }
 0x1f2   :  { %1713 = vrot.lane.b32.xlu0 %v1707_v1, %s2039_s15  ;;  %1723 = vrot.lane.b32.xlu1 %v1707_v1, %s2030_s14 }
 0x1f3   :  { %1718 = vrot.lane.b32.xlu2 %v1707_v1, %s2041_s17 }
 0x1fa   :  { %784 = vrot.lane.b32.xlu0 %v758_v36, %s2038_s12  ;;  %837 = vrot.lane.b32.xlu1 %v758_v36, %s2036_s11 }
 0x1fb   :  { %811 = vrot.lane.b32.xlu2 %v758_v36, %s2037_s2 }
 0x202   :  { %912 = vrot.lane.b32.xlu0 %v758_v36, %s2041_s17  ;;  %885 = vrot.lane.b32.xlu1 %v758_v36, %s2039_s15 }
 0x203   :  { %1728 = vrot.lane.b32.xlu2 %v1727_v37, %s2040_s16 }
 0x20b   :  { %939 = vrot.lane.b32.xlu2 %v758_v36, %s2030_s14 }
 0x20d   :  { %v1594_v24 = vpop.permute.xlu2 %1593 }
 0x20e   :  { %v1596_v26 = vunpack.i.h.bf16 %v1594_v24  ;;  %v2301_v54 = vunpack.i.l.bf16 %v1594_v24 }
 0x210   :  { %v787_v55 = vsel %vm786_vm1, %v2301_v54, %v1596_v26 }
 0x211   :  { %v1732_v28 = vpack.i.bf16 %v787_v55, %v2035_v42 }
 0x213   :  { %1733 = vrot.lane.b32.xlu0 %v1732_v28, %s2040_s16 }
 0x215   :  { %v2307_v30 = vpop.permute.xlu2 %1608 }
 0x21d   :  { %v2309_v31 = vpop.permute.xlu2 %1618 }
 0x21e   :  { %v3154_v47 = vunpack.i.h.bf16 %v2309_v31 }
 0x224   :  { %v2311_v33 = vpop.permute.xlu0 %1603  ;;  %v2313_v34 = vpop.permute.xlu1 %1598 }
 0x225   :  { %v2315_v32 = vpop.permute.xlu2 %1633  ;;  %v1606_v29 = vunpack.i.h.bf16 %v2311_v33  ;;  %v1601_v45 = vunpack.i.h.bf16 %v2313_v34 }
 0x226   :  { %v3151_v46 = vunpack.i.l.bf16 %v2315_v32  ;;  %v3153_v0 = vunpack.i.h.bf16 %v2315_v32 }
 0x228   :  { %v814_v58 = vsel %vm616_vm0, %v1601_v45, %v3151_v46 }
 0x22c   :  { %v2317_v27 = vpop.permute.xlu0 %1613  ;;  %v2319_v23 = vpop.permute.xlu1 %1623 }
 0x22d   :  { %v2321_v18 = vpop.permute.xlu2 %1653  ;;  %v3163_v48 = vunpack.i.h.bf16 %v2317_v27 }
 0x22e   :  { %v3159_v40 = vunpack.i.h.bf16 %v2321_v18 }
 0x234   :  { %v2323_v25 = vpop.permute.xlu1 %1638  ;;  %v1629_v21 = vpop.permute.xlu0 %1628 }
 0x235   :  { %v1640_v35 = vunpack.i.l.bf16 %v2323_v25  ;;  %v1630_v38 = vunpack.i.l.bf16 %v1629_v21  ;;  %v2327_v39 = vpop.permute.xlu2 %1673  ;;  %v1631_v4 = vunpack.i.h.bf16 %v1629_v21  ;;  %v1641_v21 = vunpack.i.h.bf16 %v2323_v25 }
 0x237   :  { %v788_v41 = vsel %vm786_vm1, %v1596_v26, %v1630_v38  ;;  %v841_v42 = vsel %vm839_vm2, %v1606_v29, %v1640_v35  ;;  %v789_v11 = vsel %vm786_vm1, %v2301_v54, %v1631_v4 }
 0x238   :  { %v1737_v43 = vpack.i.bf16 %v1630_v38, %v788_v41  ;;  %v1742_v44 = vpack.i.bf16 %v3159_v40, %v841_v42  ;;  %v3162_v38 = vunpack.i.l.bf16 %v2327_v39  ;;  %v2420_v41 = vunpack.i.l.bf16 %v2313_v34 }
 0x239   :  { %v3152_v42 = vunpack.i.h.bf16 %v2319_v23 }
 0x23a   :  { %1738 = vrot.lane.b32.xlu1 %v1737_v43, %s2040_s16  ;;  %1743 = vrot.lane.b32.xlu2 %v1742_v44, %s2040_s16  ;;  %v3155_v43 = vunpack.i.l.bf16 %v2319_v23  ;;  %v2425_v44 = vunpack.i.l.bf16 %v2321_v18 }
 0x23c   :  { %v1644_v49 = vpop.permute.xlu1 %1643  ;;  %v2342_v50 = vpop.permute.xlu0 %1648 }
 0x23d   :  { %v1646_v51 = vunpack.i.h.bf16 %v1644_v49  ;;  %v2344_v52 = vunpack.i.l.bf16 %v1644_v49  ;;  %v3157_v53 = vunpack.i.h.bf16 %v2342_v50  ;;  %v2348_v56 = vunpack.i.l.bf16 %v2342_v50  ;;  %v2350_v57 = vpop.permute.xlu2 %1678 }
 0x23e   :  { %v1680_v59 = vunpack.i.l.bf16 %v2350_v57 }
 0x23f   :  { %v1747_v60 = vpack.i.bf16 %v3157_v53, %v814_v58  ;;  %v2364_v61 = vsel %vm914_vm3, %v3154_v47, %v2348_v56  ;;  %v2370_v62 = vsel %vm887_vm4, %v3163_v48, %v2344_v52 }
 0x240   :  { %v2374_v63 = vsel %vm887_vm4, %v1680_v59, %v2344_v52  ;;  %v890_v2 = vsel %vm887_vm4, %v1646_v51, %v1680_v59 }
 0x241   :  { %v2377_v3 = vpack.i.bf16 %v890_v2, %v1646_v51 }
 0x242   :  { %1748 = vrot.lane.b32.xlu1 %v1747_v60, %s2040_s16 }
 0x244   :  { %v2380_v5 = vpop.permute.xlu0 %1658  ;;  %v1664_v6 = vpop.permute.xlu1 %1663 }
 0x245   :  { %v1666_v7 = vunpack.i.h.bf16 %v1664_v6  ;;  %v1665_v8 = vunpack.i.l.bf16 %v1664_v6  ;;  %v2382_v9 = vpop.permute.xlu2 %1698 }
 0x246   :  { %v1700_v10 = vunpack.i.l.bf16 %v2382_v9 }
 0x247   :  { %v790_v12 = vsel %vm786_vm1, %v1631_v4, %v1665_v8  ;;  %v843_v4 = vsel %vm839_vm2, %v1641_v21, %v3162_v38 }
 0x248   :  { %v792_v13 = vsel %vm786_vm1, %v1666_v7, %v1700_v10  ;;  %v1752_v14 = vpack.i.bf16 %v790_v12, %v789_v11  ;;  %v942_v11 = vsel %vm941_vm5, %v3155_v43, %v3152_v42 }
 0x249   :  { %v1777_v15 = vpack.i.bf16 %v1700_v10, %v792_v13 }
 0x24a   :  { %1753 = vrot.lane.b32.xlu2 %v1752_v14, %s2040_s16  ;;  %v3164_v14 = vunpack.i.h.bf16 %v2382_v9 }
 0x24b   :  { %1778 = vrot.lane.b32.xlu1 %v1777_v15, %s2040_s16  ;;  %v791_v15 = vsel %vm786_vm1, %v2301_v54, %v1666_v7 }
 0x24c   :  { %v2391_v16 = vpop.permute.xlu0 %1668  ;;  %v2393_v17 = vpop.permute.xlu1 %1683  ;;  %v1767_v6 = vpack.i.bf16 %v791_v15, %v1665_v8  ;;  %v2511_v15 = vunpack.i.l.bf16 %v2307_v30 }
 0x24d   :  { %v3161_v1 = vunpack.i.l.bf16 %v2391_v16  ;;  %v1686_v19 = vunpack.i.h.bf16 %v2393_v17  ;;  %v2398_v20 = vpop.permute.xlu2 %1718  ;;  %v1671_v26 = vunpack.i.h.bf16 %v2391_v16  ;;  %v3158_v55 = vunpack.i.l.bf16 %v2393_v17 }
 0x24e   :  { %v1720_v22 = vunpack.i.l.bf16 %v2398_v20 }
 0x24f   :  { %v816_v36 = vsel %vm616_vm0, %v3153_v0, %v3161_v1  ;;  %v2435_v59 = vsel %vm914_vm3, %v3158_v55, %v2348_v56  ;;  %v817_v2 = vsel %vm616_vm0, %v2420_v41, %v1671_v26  ;;  %v793_v0 = vsel %vm786_vm1, %v2301_v54, %v3164_v14 }
 0x250   :  { %v1762_v37 = vpack.i.bf16 %v1686_v19, %v816_v36  ;;  %v920_v24 = vsel %vm914_vm3, %v1720_v22, %v2348_v56  ;;  %v1772_v13 = vpack.i.bf16 %v817_v2, %v942_v11  ;;  %v2508_v54 = vunpack.i.h.bf16 %v2307_v30 }
 0x251   :  { %v2414_v28 = vpack.i.bf16 %v1640_v35, %v920_v24  ;;  %v2471_v24 = vunpack.i.l.bf16 %v2311_v33  ;;  %v919_v43 = vsel %vm914_vm3, %v1686_v19, %v1720_v22 }
 0x252   :  { %1763 = vrot.lane.b32.xlu2 %v1762_v37, %s2040_s16  ;;  %v2544_v40 = vsel %vm864_vm6, %v2511_v15, %v2508_v54 }
 0x253   :  { %v840_v34 = vsel %vm839_vm2, %v2471_v24, %v1606_v29  ;;  %v1721_v29 = vunpack.i.h.bf16 %v2398_v20 }
 0x254   :  { %v2427_v49 = vpop.permute.xlu0 %1688  ;;  %v1694_v35 = vpop.permute.xlu1 %1693 }
 0x255   :  { %v1691_v51 = vunpack.i.h.bf16 %v2427_v49  ;;  %v3160_v58 = vunpack.i.l.bf16 %v2427_v49  ;;  %v2437_v60 = vpop.permute.xlu2 %811 }
 0x257   :  { %v1757_v10 = vpack.i.bf16 %v1691_v51, %v843_v4  ;;  %v2459_v12 = vsel %vm941_vm5, %v3160_v58, %v2425_v44 }
 0x259   :  { %1758 = vrot.lane.b32.xlu0 %v1757_v10, %s2040_s16  ;;  %v2475_v10 = vunpack.i.h.bf16 %v1694_v35 }
 0x25a   :  { %1773 = vrot.lane.b32.xlu2 %v1772_v13, %s2040_s16  ;;  %v2477_v13 = vunpack.i.l.bf16 %v1694_v35  ;;  %v2495_v35 = vunpack.i.h.bf16 %v2380_v5 }
 0x25c   :  { %v2466_v36 = vpop.permute.xlu0 %1708  ;;  %v2468_v37 = vpop.permute.xlu1 %1703 }
 0x25d   :  { %v3156_v4 = vunpack.i.h.bf16 %v2466_v36  ;;  %v1705_v2 = vunpack.i.l.bf16 %v2468_v37  ;;  %v1729_v11 = vpop.permute.xlu2 %1728 }
 0x25e   :  { %v2479_v46 = vunpack.i.h.bf16 %v1729_v11  ;;  %v2481_v7 = vunpack.i.l.bf16 %v1729_v11  ;;  %v2498_v11 = vunpack.i.l.bf16 %v2380_v5  ;;  %v2516_v5 = vsel %vm864_vm6, %v2477_v13, %v2475_v10 }
 0x25f   :  { %v2484_v42 = vpack.i.bf16 %v1705_v2, %v2364_v61  ;;  %v846_v47 = vsel %vm839_vm2, %v2471_v24, %v3156_v4  ;;  %v818_v33 = vsel %vm616_vm0, %v1671_v26, %v1705_v2 }
 0x260   :  { %v2503_v61 = vsel %vm864_vm6, %v2481_v7, %v2479_v46  ;;  %v1802_v8 = vpack.i.bf16 %v846_v47, %v793_v0  ;;  %v2527_v30 = vsel %vm864_vm6, %v2498_v11, %v2495_v35 }
 0x261   :  { %1346 = vmatpush.msra.mxu0 %v2503_v61  ;;  %1768 = vrot.lane.b32.xlu0 %v1767_v6, %s2040_s16 }
 0x262   :  { %1803 = vrot.lane.b32.xlu2 %v1802_v8, %s2040_s16  ;;  %v1681_v8 = vunpack.i.h.bf16 %v2350_v57  ;;  %v813_v57 = vsel %vm616_vm0, %v2420_v41, %v1601_v45 }
 0x263   :  { %1347 = vmatpush.msra.mxu0 %v2516_v5  ;;  %v1787_v22 = vpack.i.bf16 %v813_v57, %v919_v43  ;;  %v1710_v43 = vunpack.i.l.bf16 %v2466_v36 }
 0x264   :  { %v2522_v0 = vpop.permute.xlu0 %1713  ;;  %v1724_v6 = vpop.permute.xlu1 %1723 }
 0x265   :  { %v3165_v47 = vunpack.i.l.bf16 %v2522_v0  ;;  %v1725_v4 = vunpack.i.l.bf16 %v1724_v6  ;;  %v940_v53 = vpop.permute.xlu2 %939  ;;  %1348 = vmatpush.msra.mxu0 %v2527_v30  ;;  %v1726_v48 = vunpack.i.h.bf16 %v1724_v6  ;;  %v1797_v6 = vpack.i.bf16 %v1721_v29, %v818_v33 }
 0x266   :  { %v2539_v55 = vsel %vm941_vm5, %v940_v53, %v2425_v44  ;;  %v3184_v33 = vunpack.i.h.bf16 %v2317_v27 }
 0x267   :  { %v2552_v19 = vsel %vm941_vm5, %v1725_v4, %v2425_v44  ;;  %1349 = vmatpush.msra.mxu0 %v2544_v40  ;;  %v892_v58 = vsel %vm887_vm4, %v1681_v8, %v3165_v47  ;;  %v946_v45 = vsel %vm941_vm5, %v1691_v51, %v1725_v4  ;;  %v948_v51 = vsel %vm941_vm5, %v1726_v48, %v940_v53 }
 0x268   :  { %v1822_v38 = vpack.i.bf16 %v892_v58, %v1681_v8  ;;  %v1782_v14 = vpack.i.bf16 %v840_v34, %v946_v45  ;;  %v1706_v8 = vunpack.i.h.bf16 %v2468_v37  ;;  %v1615_v53 = vunpack.i.l.bf16 %v2317_v27 }
 0x269   :  { %1788 = vrot.lane.b32.xlu0 %v1787_v22, %s2040_s16  ;;  %v3183_v37 = vunpack.i.h.bf16 %v2382_v9  ;;  %v3187_v9 = vunpack.i.l.bf16 %v2427_v49  ;;  %v3190_v4 = vunpack.i.h.bf16 %v2342_v50  ;;  %v1620_v49 = vunpack.i.l.bf16 %v2309_v31 }
 0x26a   :  { %1823 = vrot.lane.b32.xlu2 %v1822_v38, %s2040_s16  ;;  %1783 = vrot.lane.b32.xlu1 %v1782_v14, %s2040_s16  ;;  %v1676_v38 = vunpack.i.h.bf16 %v2327_v39  ;;  %v842_v14 = vsel %vm839_vm2, %v2471_v24, %v1641_v21  ;;  %v819_v21 = vsel %vm616_vm0, %v2420_v41, %v1706_v8  ;;  %v820_v50 = vsel %vm616_vm0, %v1706_v8, %v2437_v60 }
 0x26b   :  { %v1842_v26 = vpack.i.bf16 %v842_v14, %v948_v51  ;;  %v888_v51 = vsel %vm887_vm4, %v1615_v53, %v3184_v33  ;;  %v3185_v14 = vunpack.i.l.bf16 %v2327_v39 }
 0x26c   :  { %v2569_v57 = vpop.permute.xlu0 %784  ;;  %v2571_v58 = vpop.permute.xlu1 %837  ;;  %v845_v22 = vsel %vm839_vm2, %v1676_v38, %v1710_v43  ;;  %v1832_v47 = vpack.i.bf16 %v888_v51, %v1615_v53  ;;  %v3194_v53 = vunpack.i.h.bf16 %v2315_v32 }
 0x26d   :  { %v1792_v2 = vpack.i.bf16 %v1726_v48, %v845_v22  ;;  %v794_v34 = vsel %vm786_vm1, %v3183_v37, %v2569_v57  ;;  %v3186_v22 = vunpack.i.l.bf16 %v2391_v16  ;;  %v844_v16 = vsel %vm839_vm2, %v2471_v24, %v1676_v38 }
 0x271   :  { %1798 = vrot.lane.b32.xlu0 %v1797_v6, %s2040_s16 }
 0x272   :  { %1843 = vrot.lane.b32.xlu2 %v1842_v26, %s2040_s16  ;;  %1793 = vrot.lane.b32.xlu1 %v1792_v2, %s2040_s16  ;;  %v3188_v2 = vunpack.i.h.bf16 %v2321_v18  ;;  %v3191_v18 = vunpack.i.h.bf16 %v2466_v36  ;;  %v3193_v36 = vunpack.i.h.bf16 %v2309_v31  ;;  %v1716_v31 = vunpack.i.h.bf16 %v2522_v0 }
 0x274   :  { %v913_v20 = vpop.permute.xlu0 %912  ;;  %v886_v25 = vpop.permute.xlu1 %885  ;;  %v944_v37 = vsel %vm941_vm5, %v3188_v2, %v3187_v9  ;;  %v847_v39 = vsel %vm839_vm2, %v3191_v18, %v2571_v58  ;;  %v915_v24 = vsel %vm914_vm3, %v1620_v49, %v3193_v36  ;;  %v1877_v9 = vpack.i.bf16 %v2571_v58, %v2459_v12 }
 0x275   :  { %v922_v48 = vsel %vm914_vm3, %v913_v20, %v2348_v56  ;;  %v895_v45 = vsel %vm887_vm4, %v886_v25, %v2344_v52  ;;  %v3189_v56 = vunpack.i.l.bf16 %v2393_v17  ;;  %v1807_v1 = vpack.i.bf16 %v819_v21, %v944_v37 }
 0x276   :  { %v1907_v6 = vpack.i.bf16 %v3185_v14, %v922_v48  ;;  %v1927_v26 = vpack.i.bf16 %v3186_v22, %v895_v45  ;;  %v1812_v17 = vpack.i.bf16 %v844_v16, %v847_v39  ;;  %v921_v38 = vsel %vm914_vm3, %v1721_v29, %v913_v20 }
 0x277   :  { %v917_v27 = vsel %vm914_vm3, %v3190_v4, %v3189_v56  ;;  %v1817_v8 = vpack.i.bf16 %v915_v24, %v1620_v49  ;;  %v815_v21 = vsel %vm616_vm0, %v2420_v41, %v3194_v53  ;;  %v894_v29 = vsel %vm887_vm4, %v1716_v31, %v886_v25  ;;  %v1483_v56 = vld [vmem:[%s3149_s7 + $0x8] sm:$0xff] }
 0x278   :  { %v1857_v33 = vpack.i.bf16 %v794_v34, %v917_v27  ;;  %v1882_v34 = vpack.i.bf16 %v2503_v61, %v2481_v7  ;;  %v1852_v48 = vpack.i.bf16 %v815_v21, %v921_v38  ;;  %v3195_v20 = vunpack.i.h.bf16 %v2319_v23 }
 0x279   :  { %1808 = vrot.lane.b32.xlu0 %v1807_v1, %s2040_s16  ;;  %v1872_v1 = vpack.i.bf16 %v2544_v40, %v2511_v15  ;;  %v1862_v51 = vpack.i.bf16 %v894_v29, %v1716_v31  ;;  %v1837_v14 = vpack.i.bf16 %v2516_v5, %v2477_v13  ;;  %v1867_v25 = vpack.i.bf16 %v2527_v30, %v2498_v11 }
 0x27a   :  { %1858 = vrot.lane.b32.xlu2 %v1857_v33, %s2040_s16  ;;  %1833 = vrot.lane.b32.xlu1 %v1832_v47, %s2040_s16  ;;  %v3192_v47 = vunpack.i.l.bf16 %v2319_v23  ;;  %v943_v45 = vsel %vm941_vm5, %v3195_v20, %v2425_v44  ;;  %v3196_v23 = vpack.i.bf16 %v2437_v60, %v2435_v59  ;;  %v3199_v2 = vpack.i.bf16 %v2552_v19, %v2539_v55  ;;  %v1482_v55 = vld [vmem:[%s3149_s7] sm:$0xff]  ;;  %v1484_v33 = vld [vmem:[%s3149_s7 + $0x10] sm:$0xff] }
 0x27b   :  { %v1887_v41 = vpack.i.bf16 %v1710_v43, %v943_v45  ;;  %v3198_v43 = vunpack.i.l.bf16 %v2315_v32  ;;  %v1937_v59 = vpack.i.bf16 %v2495_v35, %v2475_v10  ;;  %v1451_v32 = vld [vmem:[%s3148_s6 + $0x8] sm:$0xff]  ;;  %v1450_v19 = vld [vmem:[%s3148_s6] sm:$0xff] }
 0x27c   :  { %v1847_v4 = vpack.i.bf16 %v3192_v47, %v820_v50 }
 0x281   :  { %1813 = vrot.lane.b32.xlu0 %v1812_v17, %s2040_s16 }
 0x282   :  { %1873 = vrot.lane.b32.xlu2 %v1872_v1, %s2040_s16  ;;  %1848 = vrot.lane.b32.xlu1 %v1847_v4, %s2040_s16 }
 0x289   :  { %1818 = vrot.lane.b32.xlu0 %v1817_v8, %s2040_s16 }
 0x28a   :  { %1883 = vrot.lane.b32.xlu2 %v1882_v34, %s2040_s16  ;;  %1853 = vrot.lane.b32.xlu1 %v1852_v48, %s2040_s16 }
 0x291   :  { %1828 = vrot.lane.b32.xlu0 %v2377_v3, %s2040_s16  ;;  %v3197_v3 = vunpack.i.l.bf16 %v2522_v0  ;;  %v3201_v0 = vpack.i.bf16 %v2479_v46, %v2370_v62  ;;  %v1452_v62 = vld [vmem:[%s3148_s6 + $0x10] sm:$0xff] }
 0x292   :  { %1888 = vrot.lane.b32.xlu2 %v1887_v41, %s2040_s16  ;;  %1863 = vrot.lane.b32.xlu1 %v1862_v51, %s2040_s16 }
 0x293   :  { %v893_v44 = vsel %vm887_vm4, %v3197_v3, %v2344_v52 }
 0x294   :  { %v1917_v22 = vpack.i.bf16 %v3198_v43, %v893_v44  ;;  %v2686_v60 = vpop.permute.xlu2 %1743 }
 0x295   :  { %v1746_v29 = vunpack.i.h.bf16 %v2686_v60 }
 0x299   :  { %1838 = vrot.lane.b32.xlu0 %v1837_v14, %s2040_s16 }
 0x29a   :  { %1898 = vrot.lane.b32.xlu2 %v3196_v23, %s2040_s16  ;;  %1868 = vrot.lane.b32.xlu1 %v1867_v25, %s2040_s16 }
 0x2a1   :  { %1903 = vrot.lane.b32.xlu0 %v3199_v2, %s2040_s16 }
 0x2a2   :  { %1918 = vrot.lane.b32.xlu2 %v1917_v22, %s2040_s16  ;;  %1878 = vrot.lane.b32.xlu1 %v1877_v9, %s2040_s16 }
 0x2a4   :  { %v2695_v52 = vpop.permute.xlu2 %1753 }
 0x2a5   :  { %v1756_v39 = vunpack.i.h.bf16 %v2695_v52 }
 0x2a9   :  { %1908 = vrot.lane.b32.xlu0 %v1907_v6, %s2040_s16  ;;  %v1453_v6 = vld [vmem:[%s3148_s6 + $0x18] sm:$0xff] }
 0x2aa   :  { %1938 = vrot.lane.b32.xlu2 %v1937_v59, %s2040_s16  ;;  %1893 = vrot.lane.b32.xlu1 %v2414_v28, %s2040_s16  ;;  %v3200_v28 = vpack.i.bf16 %v2569_v57, %v2374_v63  ;;  %v2723_v63 = vpop.permute.xlu0 %1733 }
 0x2ac   :  { %v2707_v12 = vpop.permute.xlu2 %1763  ;;  %v2719_v58 = vpop.permute.xlu1 %1738 }
 0x2b1   :  { %1913 = vrot.lane.b32.xlu0 %v2484_v42, %s2040_s16  ;;  %v1485_v42 = vld [vmem:[%s3149_s7 + $0x18] sm:$0xff] }
 0x2b2   :  { %1461 = vperm.xlu2 %1591, %v1451_v32   ;;  %1928 = vrot.lane.b32.xlu1 %v1927_v26, %s2040_s16 }
 0x2b4   :  { %v2725_v57 = vpop.permute.xlu2 %1773  ;;  %v2733_v26 = vpop.permute.xlu1 %1748 }
 0x2b5   :  { %v1775_v44 = vunpack.i.l.bf16 %v2725_v57 }
 0x2b9   :  { %1923 = vrot.lane.b32.xlu0 %v3200_v28, %s2040_s16 }
 0x2ba   :  { %1488 = vperm.xlu2 %1591, %v1482_v55   ;;  %1933 = vrot.lane.b32.xlu1 %v3201_v0, %s2040_s16 }
 0x2bc   :  { %v2740_v27 = vpop.permute.xlu2 %1803 }
 0x2bd   :  { %v2749_v50 = vpop.permute.xlu1 %1778  ;;  %v1806_v25 = vunpack.i.h.bf16 %v2740_v27 }
 0x2c1   :  { %1040 = vrot.lane.b32.xlu0 %v2508_v54, %s2040_s16 }
 0x2c2   :  { %1503 = vperm.xlu2 %1591, %v1485_v42   ;;  %1456 = vperm.xlu1 %1590, %v1450_v19   ;;  %v3167_v42 = vunpack.i.l.bf16 %v2686_v60 }
 0x2c4   :  { %v2756_v49 = vpop.permute.xlu2 %1823 }
 0x2c9   :  { %1466 = vperm.xlu0 %1589, %v1452_v62  }
 0x2ca   :  { %1471 = vperm.xlu1 %1590, %v1453_v6  }
 0x2cb   :  { %v2735_v37 = vpop.permute.xlu0 %1758 }
 0x2cc   :  { %v2762_v4 = vpop.permute.xlu2 %1843  ;;  %v1761_v21 = vunpack.i.h.bf16 %v2735_v37  ;;  %v3174_v43 = vunpack.i.l.bf16 %v2735_v37 }
 0x2cd   :  { %v1845_v38 = vunpack.i.l.bf16 %v2762_v4  ;;  %v1846_v9 = vunpack.i.h.bf16 %v2762_v4 }
 0x2cf   :  { %v1154_v6 = vsel %vm864_vm6, %v1846_v9, %v3174_v43  ;;  %v1766_v9 = vunpack.i.h.bf16 %v2707_v12 }
 0x2d1   :  { %1493 = vperm.xlu0 %1589, %v1483_v56  }
 0x2d2   :  { %1498 = vperm.xlu1 %1590, %v1484_v33  }
 0x2d3   :  { %v2745_v18 = vpop.permute.xlu0 %1768 }
 0x2d4   :  { %v1770_v16 = vunpack.i.l.bf16 %v2745_v18  ;;  %v2787_v51 = vpop.permute.xlu2 %1858 }
 0x2d6   :  { %v2754_v17 = vsel %vm864_vm6, %v1756_v39, %v1770_v16 }
 0x2db   :  { %v2758_v1 = vpop.permute.xlu0 %1788 }
 0x2dc   :  { %v2760_v47 = vpop.permute.xlu1 %1783  ;;  %v2812_v19 = vpop.permute.xlu2 %1873 }
 0x2dd   :  { %v1785_v8 = vunpack.i.l.bf16 %v2760_v47  ;;  %v1786_v55 = vunpack.i.h.bf16 %v2760_v47 }
 0x2df   :  { %v1188_v48 = vsel %vm864_vm6, %v1761_v21, %v1785_v8  ;;  %v1776_v21 = vunpack.i.h.bf16 %v2725_v57 }
 0x2e3   :  { %v2764_v36 = vpop.permute.xlu0 %1798 }
 0x2e4   :  { %v2766_v24 = vpop.permute.xlu1 %1793  ;;  %v3168_v33 = vunpack.i.l.bf16 %v2764_v36 }
 0x2e5   :  { %v1796_v53 = vunpack.i.h.bf16 %v2766_v24  ;;  %v1795_v2 = vunpack.i.l.bf16 %v2766_v24  ;;  %v2998_v24 = vld [vmem:[#allocation5 + $0x18] sm:$0xff] }
 0x2e7   :  { %v1190_v34 = vsel %vm864_vm6, %v1796_v53, %v1845_v38  ;;  %v1152_v53 = vsel %vm864_vm6, %v1786_v55, %v3167_v42  ;;  %v1791_v55 = vunpack.i.h.bf16 %v2758_v1 }
 0x2e8   :  { %1305 = vmatpush.msrb.mxu3 %v1190_v34  ;;  %v3171_v34 = vunpack.i.l.bf16 %v2758_v1 }
 0x2ea   :  { %1306 = vmatpush.msrb.mxu3 %v1188_v48 }
 0x2eb   :  { %v2778_v31 = vpop.permute.xlu0 %1808 }
 0x2ec   :  { %v1810_v20 = vunpack.i.l.bf16 %v2778_v31  ;;  %v2782_v45 = vpop.permute.xlu1 %1833  ;;  %v1811_v16 = vunpack.i.h.bf16 %v2778_v31 }
 0x2ee   :  { %v1186_v41 = vsel %vm864_vm6, %v1746_v29, %v1810_v20  ;;  %v1801_v29 = vunpack.i.h.bf16 %v2764_v36 }
 0x2ef   :  { %1307 = vmatpush.msrb.mxu3 %v1186_v41 }
 0x2f3   :  { %v2789_v14 = vpop.permute.xlu0 %1813 }
 0x2f4   :  { %v1816_v23 = vunpack.i.h.bf16 %v2789_v14  ;;  %v1815_v3 = vunpack.i.l.bf16 %v2789_v14  ;;  %v2796_v22 = vpop.permute.xlu1 %1848 }
 0x2f5   :  { %v1851_v59 = vunpack.i.h.bf16 %v2796_v22  ;;  %v3166_v62 = vunpack.i.l.bf16 %v2796_v22 }
 0x2f6   :  { %v1158_v32 = vsel %vm864_vm6, %v1806_v25, %v1815_v3  ;;  %v1156_v0 = vsel %vm864_vm6, %v1816_v23, %v1795_v2 }
 0x2f7   :  { %1276 = vmatpush.msrb.mxu2 %v1158_v32  ;;  %v1184_v28 = vsel %vm864_vm6, %v1851_v59, %v1775_v44  ;;  %v1150_v23 = vsel %vm864_vm6, %v1811_v16, %v3166_v62  ;;  %v3170_v59 = vunpack.i.l.bf16 %v2707_v12  ;;  %v3173_v32 = vunpack.i.l.bf16 %v2787_v51 }
 0x2f8   :  { %1308 = vmatpush.msrb.mxu3 %v1184_v28  ;;  %v1751_v16 = vunpack.i.h.bf16 %v2733_v26 }
 0x2f9   :  { %1277 = vmatpush.msrb.mxu2 %v1156_v0  ;;  %v1148_v0 = vsel %vm864_vm6, %v1776_v21, %v3168_v33 }
 0x2fb   :  { %v2818_v56 = vpop.permute.xlu0 %1818  ;;  %1278 = vmatpush.msrb.mxu2 %v1154_v6  ;;  %v2845_v6 = vld [vmem:[#allocation5 + $0x10] sm:$0xff] }
 0x2fc   :  { %v2827_v48 = vpop.permute.xlu1 %1853  ;;  %v3175_v62 = vunpack.i.h.bf16 %v2818_v56  ;;  %v1820_v42 = vunpack.i.l.bf16 %v2818_v56  ;;  %1566 = vmatmul.msk.f32.vlgmr.msra.gmra.mxu0 %vm914_vm3, %v2845_v6 }
 0x2fd   :  { %1279 = vmatpush.msrb.mxu2 %v1152_v53  ;;  %v1856_v41 = vunpack.i.h.bf16 %v2827_v48  ;;  %v3169_v25 = vunpack.i.l.bf16 %v2827_v48  ;;  %v3172_v53 = vunpack.i.l.bf16 %v2733_v26 }
 0x2ff   :  { %1280 = vmatpush.msrb.mxu2 %v1150_v23  ;;  %v1182_v28 = vsel %vm864_vm6, %v1801_v29, %v3169_v25  ;;  %v3176_v23 = vunpack.i.h.bf16 %v2787_v51  ;;  %v1180_v29 = vsel %vm864_vm6, %v1766_v9, %v3171_v34  ;;  %v1146_v21 = vsel %vm864_vm6, %v1856_v41, %v3170_v59  ;;  %v2864_v25 = vpop.permute.xlu2 %1883 }
 0x300   :  { %1309 = vmatpush.msrb.mxu3 %v1182_v28  ;;  %v1805_v28 = vunpack.i.l.bf16 %v2740_v27  ;;  %v1178_v9 = vsel %vm864_vm6, %v1751_v16, %v3173_v32  ;;  %v1144_v41 = vsel %vm864_vm6, %v1791_v55, %v3172_v53  ;;  %v1755_v59 = vunpack.i.l.bf16 %v2695_v52 }
 0x301   :  { %1281 = vmatpush.msrb.mxu2 %v1148_v0  ;;  %v1771_v0 = vunpack.i.h.bf16 %v2745_v18  ;;  %v1825_v27 = vunpack.i.l.bf16 %v2756_v49  ;;  %v1176_v55 = vsel %vm864_vm6, %v1820_v42, %v3175_v62  ;;  %v3178_v32 = vunpack.i.l.bf16 %v2719_v58  ;;  %v2895_v62 = vld [vmem:[#allocation5 + $0x28] sm:$0xff] }
 0x302   :  { %1310 = vmatpush.msrb.mxu3 %v1180_v29  ;;  %v3177_v29 = vunpack.i.l.bf16 %v2749_v50  ;;  %v1142_v53 = vsel %vm864_vm6, %v1805_v28, %v3176_v23  ;;  %v1736_v28 = vunpack.i.h.bf16 %v2723_v63  ;;  %v2899_v23 = vunpack.i.l.bf16 %v2723_v63 }
 0x303   :  { %v2860_v33 = vpop.permute.xlu0 %1828  ;;  %1282 = vmatpush.msrb.mxu2 %v1146_v21  ;;  %v1826_v21 = vunpack.i.h.bf16 %v2756_v49 }
 0x304   :  { %v2876_v34 = vpop.permute.xlu1 %1863  ;;  %1311 = vmatpush.msrb.mxu3 %v1178_v9  ;;  %v3179_v43 = vunpack.i.h.bf16 %v2860_v33  ;;  %v1830_v9 = vunpack.i.l.bf16 %v2860_v33  ;;  %v1140_v42 = vsel %vm864_vm6, %v1771_v0, %v3177_v29  ;;  %v1138_v0 = vsel %vm864_vm6, %v1755_v59, %v1756_v39  ;;  %1567 = vmatmul.msk.f32.gmra.mxu0 %vm914_vm3, %v2895_v62 }
 0x305   :  { %1283 = vmatpush.msrb.mxu2 %v1144_v41  ;;  %v1866_v18 = vunpack.i.h.bf16 %v2876_v34  ;;  %v1865_v16 = vunpack.i.l.bf16 %v2876_v34  ;;  %v1136_v52 = vsel %vm864_vm6, %v1736_v28, %v3178_v32  ;;  %v1134_v32 = vsel %vm864_vm6, %v2899_v23, %v2477_v13  ;;  %v959_v34 = vld [vmem:[#allocation5 + $0x48] sm:$0xff] }
 0x306   :  { %1312 = vmatpush.msrb.mxu3 %v1176_v55  ;;  %v1835_v55 = vunpack.i.l.bf16 %v2782_v45  ;;  %v1170_v29 = vsel %vm864_vm6, %v1830_v9, %v3179_v43  ;;  %v1135_v9 = vsel %vm864_vm6, %v2899_v23, %v2481_v7  ;;  %v2941_v43 = vld [vmem:[#allocation5 + $0x40] sm:$0xff]  ;;  %v1876_v7 = vunpack.i.h.bf16 %v2812_v19 }
 0x307   :  { %1284 = vmatpush.msrb.mxu2 %v1142_v53  ;;  %v1174_v41 = vsel %vm864_vm6, %v1865_v16, %v1866_v18  ;;  %v3182_v53 = vunpack.i.h.bf16 %v2782_v45  ;;  %v1172_v16 = vsel %vm864_vm6, %v1825_v27, %v1826_v21  ;;  %v2923_v59 = vpop.permute.xlu2 %1888  ;;  %v1192_v31 = vsel %vm864_vm6, %v2508_v54, %v2899_v23 }
 0x308   :  { %1313 = vmatpush.msrb.mxu3 %v1174_v41  ;;  %v3181_v41 = vunpack.i.h.bf16 %v2864_v25  ;;  %v1890_v4 = vunpack.i.l.bf16 %v2923_v59  ;;  %v3204_v54 = vunpack.i.l.bf16 %v2686_v60  ;;  %v3207_v60 = vunpack.i.l.bf16 %v2787_v51 }
 0x309   :  { %1285 = vmatpush.msrb.mxu2 %v1140_v42  ;;  %v1885_v42 = vunpack.i.l.bf16 %v2864_v25 }
 0x30a   :  { %1314 = vmatpush.msrb.mxu3 %v1172_v16 }
 0x30b   :  { %v2911_v63 = vpop.permute.xlu0 %1838  ;;  %1286 = vmatpush.msrb.mxu2 %v1138_v0  ;;  %v1168_v0 = vsel %vm864_vm6, %v1835_v55, %v3182_v53  ;;  %v1875_v55 = vunpack.i.l.bf16 %v2812_v19 }
 0x30c   :  { %v2921_v39 = vpop.permute.xlu1 %1868  ;;  %1315 = vmatpush.msrb.mxu3 %v1170_v29  ;;  %v3180_v27 = vunpack.i.h.bf16 %v2911_v63  ;;  %v1840_v16 = vunpack.i.l.bf16 %v2911_v63  ;;  %1568 = vmatmul.msk.f32.gmra.mxu0 %vm914_vm3, %v2941_v43 }
 0x30d   :  { %1287 = vmatpush.msrb.mxu2 %v1136_v52  ;;  %v1871_v28 = vunpack.i.h.bf16 %v2921_v39  ;;  %v1870_v29 = vunpack.i.l.bf16 %v2921_v39  ;;  %v1166_v52 = vsel %vm864_vm6, %v1885_v42, %v3181_v41  ;;  %v1133_v42 = vsel %vm864_vm6, %v2899_v23, %v2498_v11  ;;  %v2961_v11 = vld [vmem:[#allocation5 + $0x8] sm:$0xff] }
 0x30e   :  { %1316 = vmatpush.msrb.mxu3 %v1168_v0  ;;  %v1164_v0 = vsel %vm864_vm6, %v1840_v16, %v3180_v27  ;;  %v1132_v16 = vsel %vm864_vm6, %v2899_v23, %v2511_v15  ;;  %v1160_v53 = vsel %vm864_vm6, %v1875_v55, %v1876_v7 }
 0x30f   :  { %1288 = vmatpush.msrb.mxu2 %v1135_v9  ;;  %v2953_v9 = vld [vmem:[#allocation5] sm:$0xff] }
 0x310   :  { %1317 = vmatpush.msrb.mxu3 %v1166_v52  ;;  %v1162_v52 = vsel %vm864_vm6, %v1870_v29, %v1871_v28 }
 0x311   :  { %1289 = vmatpush.msrb.mxu2 %v1134_v32 }
 0x312   :  { %1318 = vmatpush.msrb.mxu3 %v1164_v0  ;;  %v1891_v0 = vunpack.i.h.bf16 %v2923_v59 }
 0x313   :  { %v1904_v13 = vpop.permute.xlu0 %1903  ;;  %1290 = vmatpush.msrb.mxu2 %v1133_v42 }
 0x314   :  { %v1905_v32 = vunpack.i.l.bf16 %v1904_v13  ;;  %v1906_v27 = vunpack.i.h.bf16 %v1904_v13  ;;  %v1879_v41 = vpop.permute.xlu1 %1878  ;;  %1319 = vmatpush.msrb.mxu3 %v1162_v52  ;;  %v2971_v13 = vld [vmem:[#allocation5 + $0x58] sm:$0xff]  ;;  %v1899_v52 = vpop.permute.xlu2 %1898 }
 0x315   :  { %1291 = vmatpush.msrb.mxu2 %v1132_v16  ;;  %v1881_v42 = vunpack.i.h.bf16 %v1879_v41  ;;  %v1880_v15 = vunpack.i.l.bf16 %v1879_v41  ;;  %v1195_v16 = vsel %vm864_vm6, %v2479_v46, %v2899_v23  ;;  %v1157_v46 = vsel %vm864_vm6, %v1795_v2, %v1891_v0  ;;  %1569 = vmatmul.msk.f32.gmra.mxu0 %vm914_vm3, %v2971_v13 }
 0x316   :  { %1292 = vmatmul.f32.vlgmr.msrb.gmra.mxu2 %v2953_v9  ;;  %v1191_v29 = vsel %vm864_vm6, %v1845_v38, %v1905_v32  ;;  %1320 = vmatpush.msrb.mxu3 %v1160_v53  ;;  %v1189_v38 = vsel %vm864_vm6, %v1785_v8, %v1906_v27  ;;  %v1194_v53 = vsel %vm864_vm6, %v2475_v10, %v2899_v23  ;;  %v3202_v32 = vunpack.i.l.bf16 %v2735_v37 }
 0x317   :  { %1392 = vmatpush.msra.mxu2 %v1191_v29  ;;  %1321 = vmatmul.f32.vlgmr.msrb.gmra.mxu3 %v2961_v11  ;;  %v1159_v55 = vsel %vm864_vm6, %v1815_v3, %v1881_v42  ;;  %v1187_v47 = vsel %vm864_vm6, %v1810_v20, %v1880_v15  ;;  %v1193_v10 = vsel %vm864_vm6, %v2495_v35, %v2899_v23  ;;  %v3006_v20 = vld [vmem:[#allocation5 + $0x20] sm:$0xff]  ;;  %v3203_v0 = vunpack.i.l.bf16 %v2827_v48 }
 0x318   :  { %1433 = vmatpush.msra.mxu3 %v1195_v16  ;;  %1363 = vmatpush.msra.mxu1 %v1159_v55  ;;  %v1185_v41 = vsel %vm864_vm6, %v1775_v44, %v1890_v4  ;;  %v1901_v57 = vunpack.i.h.bf16 %v1899_v52  ;;  %v1900_v44 = vunpack.i.l.bf16 %v1899_v52  ;;  %v3205_v37 = vunpack.i.l.bf16 %v2758_v1 }
 0x319   :  { %1393 = vmatpush.msra.mxu2 %v1189_v38  ;;  %v3206_v16 = vunpack.i.l.bf16 %v2796_v22  ;;  %v3208_v22 = vunpack.i.l.bf16 %v2764_v36 }
 0x31a   :  { %1434 = vmatpush.msra.mxu3 %v1194_v53  ;;  %1364 = vmatpush.msra.mxu1 %v1157_v46  ;;  %v1179_v38 = vsel %vm864_vm6, %v3207_v60, %v1900_v44  ;;  %v3028_v53 = vld [vmem:[#allocation5 + $0x30] sm:$0xff] }
 0x31b   :  { %v1909_v14 = vpop.permute.xlu0 %1908  ;;  %1394 = vmatpush.msra.mxu2 %v1187_v47  ;;  %v1151_v52 = vsel %vm864_vm6, %v3206_v16, %v1901_v57 }
 0x31c   :  { %v1911_v8 = vunpack.i.h.bf16 %v1909_v14  ;;  %v1910_v3 = vunpack.i.l.bf16 %v1909_v14  ;;  %1435 = vmatpush.msra.mxu3 %v1193_v10  ;;  %v1894_v2 = vpop.permute.xlu1 %1893  ;;  %v1919_v48 = vpop.permute.xlu2 %1918  ;;  %v3030_v14 = vld [vmem:[#allocation5 + $0x38] sm:$0xff]  ;;  %v3209_v10 = vunpack.i.h.bf16 %v2818_v56  ;;  %v3211_v56 = vunpack.i.l.bf16 %v2733_v26 }
 0x31d   :  { %v1896_v59 = vunpack.i.h.bf16 %v1894_v2  ;;  %v1895_v27 = vunpack.i.l.bf16 %v1894_v2  ;;  %1395 = vmatpush.msra.mxu2 %v1185_v41  ;;  %v1921_v1 = vunpack.i.h.bf16 %v1919_v48  ;;  %v1920_v41 = vunpack.i.l.bf16 %v1919_v48 }
 0x31e   :  { %v1155_v35 = vsel %vm864_vm6, %v3202_v32, %v1911_v8  ;;  %v1183_v42 = vsel %vm864_vm6, %v3203_v0, %v1910_v3  ;;  %1436 = vmatpush.msra.mxu3 %v1192_v31  ;;  %1295 = vmatmul.f32.gmra.mxu2 %v2998_v24  ;;  %v3210_v31 = vunpack.i.l.bf16 %v2707_v12  ;;  %v1781_v12 = vunpack.i.h.bf16 %v2749_v50 }
 0x31f   :  { %1324 = vmatmul.f32.gmra.mxu3 %v3006_v20  ;;  %1365 = vmatpush.msra.mxu1 %v1155_v35  ;;  %v1153_v23 = vsel %vm864_vm6, %v3204_v54, %v1896_v59  ;;  %v1181_v29 = vsel %vm864_vm6, %v3205_v37, %v1895_v27  ;;  %v1145_v27 = vsel %vm864_vm6, %v3211_v56, %v1921_v1  ;;  %v3212_v54 = vunpack.i.h.bf16 %v2787_v51 }
 0x320   :  { %1396 = vmatpush.msra.mxu2 %v1183_v42  ;;  %v1173_v35 = vsel %vm864_vm6, %v1826_v21, %v1920_v41  ;;  %v1741_v21 = vunpack.i.h.bf16 %v2719_v58  ;;  %v3214_v48 = vunpack.i.l.bf16 %v2749_v50  ;;  %v3215_v51 = vunpack.i.h.bf16 %v2782_v45 }
 0x321   :  { %1366 = vmatpush.msra.mxu1 %v1153_v23  ;;  %v3213_v23 = vunpack.i.h.bf16 %v2860_v33  ;;  %v3218_v45 = vunpack.i.h.bf16 %v2911_v63 }
 0x322   :  { %1397 = vmatpush.msra.mxu2 %v1181_v29 }
 0x323   :  { %v1914_v15 = vpop.permute.xlu0 %1913  ;;  %1367 = vmatpush.msra.mxu1 %v1151_v52  ;;  %v3216_v52 = vunpack.i.h.bf16 %v2864_v25 }
 0x324   :  { %v1916_v55 = vunpack.i.h.bf16 %v1914_v15  ;;  %v1915_v4 = vunpack.i.l.bf16 %v1914_v15  ;;  %1398 = vmatpush.msra.mxu2 %v1179_v38  ;;  %v1929_v46 = vpop.permute.xlu1 %1928  ;;  %v1939_v29 = vpop.permute.xlu2 %1938  ;;  %v1141_v15 = vsel %vm864_vm6, %v3214_v48, %v1781_v12 }
 0x325   :  { %v1931_v47 = vunpack.i.h.bf16 %v1929_v46  ;;  %v1930_v8 = vunpack.i.l.bf16 %v1929_v46  ;;  %v1940_v33 = vunpack.i.l.bf16 %v1939_v29  ;;  %v1941_v60 = vunpack.i.h.bf16 %v1939_v29 }
 0x326   :  { %v1149_v3 = vsel %vm864_vm6, %v3208_v22, %v1916_v55  ;;  %v1177_v2 = vsel %vm864_vm6, %v3209_v10, %v1915_v4  ;;  %1298 = vmatmul.f32.gmra.mxu2 %v3028_v53  ;;  %v3217_v4 = vunpack.i.l.bf16 %v2719_v58 }
 0x327   :  { %1368 = vmatpush.msra.mxu1 %v1149_v3  ;;  %1327 = vmatmul.f32.gmra.mxu3 %v3030_v14  ;;  %v1147_v59 = vsel %vm864_vm6, %v3210_v31, %v1931_v47  ;;  %v1175_v36 = vsel %vm864_vm6, %v1866_v18, %v1930_v8  ;;  %v960_v18 = vld [vmem:[#allocation5 + $0x50] sm:$0xff]  ;;  %v1165_v38 = vsel %vm864_vm6, %v3218_v45, %v1940_v33 }
 0x328   :  { %1399 = vmatpush.msra.mxu2 %v1177_v2  ;;  %v1137_v50 = vsel %vm864_vm6, %v3217_v4, %v1741_v21  ;;  %v1943_v2 = vld [vmem:[%s3142_s0 + $0x10] sm:$0xff] }
 0x329   :  { %1369 = vmatpush.msra.mxu1 %v1147_v59  ;;  %v1945_v21 = vld [vmem:[%s3142_s0 + $0x30] sm:$0xff] }
 0x32a   :  { %1400 = vmatpush.msra.mxu2 %v1175_v36 }
 0x32b   :  { %v1924_v32 = vpop.permute.xlu0 %1923  ;;  %1370 = vmatpush.msra.mxu1 %v1145_v27 }
 0x32c   :  { %v1926_v0 = vunpack.i.h.bf16 %v1924_v32  ;;  %v1925_v42 = vunpack.i.l.bf16 %v1924_v32  ;;  %1401 = vmatpush.msra.mxu2 %v1173_v35  ;;  %v1934_v57 = vpop.permute.xlu1 %1933 }
 0x32d   :  { %v1935_v44 = vunpack.i.l.bf16 %v1934_v57  ;;  %v1936_v49 = vunpack.i.h.bf16 %v1934_v57 }
 0x32e   :  { %v1143_v26 = vsel %vm864_vm6, %v3212_v54, %v1926_v0  ;;  %v1171_v37 = vsel %vm864_vm6, %v3213_v23, %v1925_v42  ;;  %1301 = vmatmul.f32.gmra.mxu2 %v959_v34  ;;  %v1944_v42 = vld [vmem:[%s3142_s0 + $0x20] sm:$0xff] }
 0x32f   :  { %1371 = vmatpush.msra.mxu1 %v1143_v26  ;;  %1330 = vmatmul.f32.gmra.mxu3 %v960_v18  ;;  %v1169_v16 = vsel %vm864_vm6, %v3215_v51, %v1935_v44  ;;  %v1167_v55 = vsel %vm864_vm6, %v3216_v52, %v1936_v49 }
 0x330   :  { %1402 = vmatpush.msra.mxu2 %v1171_v37 }
 0x331   :  { %1372 = vmatpush.msra.mxu1 %v1141_v15 }
 0x332   :  { %1403 = vmatpush.msra.mxu2 %v1169_v16 }
 0x333   :  { %1373 = vmatpush.msra.mxu1 %v2754_v17  ;;  %v1041_v1 = vpop.permute.xlu0 %1040  ;;  %v1163_v17 = vsel %vm864_vm6, %v1871_v28, %v1941_v60  ;;  %v1946_v60 = vld [vmem:[%s3142_s0 + $0x8] sm:$0xff] }
 0x334   :  { %1404 = vmatpush.msra.mxu2 %v1167_v55  ;;  %v1161_v58 = vsel %vm864_vm6, %v1876_v7, %v1041_v1 }
 0x335   :  { %1374 = vmatpush.msra.mxu1 %v1137_v50 }
 0x336   :  { %1405 = vmatpush.msra.mxu2 %v1165_v38 }
 0x337   :  { %1375 = vmatpush.msra.mxu1 %v2503_v61  ;;  %1570 = vmatmul.msk.f32.vlgmr.msra.gmra.mxu3 %vm914_vm3, %v2845_v6  ;;  %v3100_v61 = vpop.permute.xlu2 %1461 }
 0x338   :  { %1406 = vmatpush.msra.mxu2 %v1163_v17 }
 0x339   :  { %1376 = vmatpush.msra.mxu1 %v2516_v5 }
 0x33a   :  { %1407 = vmatpush.msra.mxu2 %v1161_v58 }
 0x33b   :  { %1408 = vmatmul.f32.vlgmr.msra.gmra.mxu2 %v2961_v11  ;;  %1377 = vmatpush.msra.mxu1 %v2527_v30  ;;  %v3102_v6 = vpop.permute.xlu0 %1466  ;;  %v1942_v11 = vld [vmem:[%s3142_s0] sm:$0xff] }
 0x33d   :  { %1378 = vmatpush.msra.mxu1 %v2544_v40 }
 0x33e   :  { %1379 = vmatmul.f32.vlgmr.msra.gmra.mxu1 %v2953_v9 }
 0x33f   :  { %1571 = vmatmul.msk.f32.gmra.mxu3 %vm914_vm3, %v2895_v62  ;;  %v1457_v62 = vpop.permute.xlu1 %1456  ;;  %v1489_v39 = vpop.permute.xlu2 %1488 }
 0x343   :  { %1411 = vmatmul.f32.gmra.mxu2 %v3006_v20  ;;  %v1494_v47 = vpop.permute.xlu0 %1493 }
 0x346   :  { %1382 = vmatmul.f32.gmra.mxu1 %v2998_v24 }
 0x347   :  { %1572 = vmatmul.msk.f32.gmra.mxu3 %vm914_vm3, %v2941_v43  ;;  %v3107_v46 = vpop.permute.xlu1 %1471  ;;  %v1504_v26 = vpop.permute.xlu2 %1503 }
 0x34b   :  { %1414 = vmatmul.f32.gmra.mxu2 %v3030_v14 }
 0x34e   :  { %1385 = vmatmul.f32.gmra.mxu1 %v3028_v53 }
 0x34f   :  { %1573 = vmatmul.msk.f32.gmra.mxu3 %vm914_vm3, %v2971_v13  ;;  %v1499_v27 = vpop.permute.xlu1 %1498 }
 0x353   :  { %1417 = vmatmul.f32.gmra.mxu2 %v960_v18 }
 0x356   :  { %1388 = vmatmul.f32.gmra.mxu1 %v959_v34 }
 0x379   :  { %v1351_v40 = vpop.f32.mrf.mxu0 }
 0x381   :  { %v1354_v43 = vpop.f32.mrf.mxu0 }
 0x389   :  { %v1357_v8 = vpop.f32.mrf.mxu0 }
 0x392   :  { %v1360_v0 = vpop.f32.mrf.mxu0 }
 0x399   :  { %v1293_v5 = vpop.f32.mrf.mxu2 }
 0x39a   :  { %v1322_v30 = vpop.f32.mrf.mxu3 }
 0x39b   :  { %v1323_v19 = vadd.f32 %v1322_v30, %v1293_v5 }
 0x39d   :  { %v1352_v25 = vadd.f32 %v1351_v40, %v1323_v19 }
 0x39f   :  { %v1474_v63 = vmul.f32 %v1457_v62, %v1352_v25 }
 0x3a1   :  { %v1506_v28 = vadd.f32 %v1489_v39, %v1474_v63  ;;  %v1296_v7 = vpop.f32.mrf.mxu2 }
 0x3a2   :  { %v1325_v9 = vpop.f32.mrf.mxu3 }
 0x3a3   :  { %v1514_v13 = vadd.f32 %v1942_v11, %v1506_v28  ;;  %v1326_v24 = vadd.f32 %v1325_v9, %v1296_v7 }
 0x3a5   :  { %v1522_v20 = vmax.f32 %v1514_v13, 0.0  ;;  %v1355_v53 = vadd.f32 %v1354_v43, %v1326_v24 }
 0x3a7   :  { %1530 = vst [vmem:[#allocation7] sm:$0xff] %v1522_v20  ;;  %v1476_v14 = vmul.f32 %v3100_v61, %v1355_v53 }
 0x3a9   :  { %v1508_v22 = vadd.f32 %v1494_v47, %v1476_v14  ;;  %v1299_v3 = vpop.f32.mrf.mxu2 }
 0x3aa   :  { %v1328_v10 = vpop.f32.mrf.mxu3 }
 0x3ab   :  { %v1516_v41 = vadd.f32 %v1943_v2, %v1508_v22  ;;  %v1329_v31 = vadd.f32 %v1328_v10, %v1299_v3 }
 0x3ad   :  { %v1524_v59 = vmax.f32 %v1516_v41, 0.0  ;;  %v1358_v36 = vadd.f32 %v1357_v8, %v1329_v31 }
 0x3af   :  { %1532 = vst [vmem:[#allocation7 + $0x10] sm:$0xff] %v1524_v59  ;;  %v1478_v56 = vmul.f32 %v3102_v6, %v1358_v36 }
 0x3b1   :  { %v1510_v32 = vadd.f32 %v1499_v27, %v1478_v56  ;;  %v1302_v35 = vpop.f32.mrf.mxu2 }
 0x3b2   :  { %v1331_v12 = vpop.f32.mrf.mxu3 }
 0x3b3   :  { %v1518_v34 = vadd.f32 %v1944_v42, %v1510_v32  ;;  %v1332_v57 = vadd.f32 %v1331_v12, %v1302_v35 }
 0x3b5   :  { %v1526_v18 = vmax.f32 %v1518_v34, 0.0  ;;  %v1361_v44 = vadd.f32 %v1360_v0, %v1332_v57 }
 0x3b7   :  { %1534 = vst [vmem:[#allocation7 + $0x20] sm:$0xff] %v1526_v18  ;;  %v1480_v54 = vmul.f32 %v3107_v46, %v1361_v44 }
 0x3b9   :  { %v1512_v23 = vadd.f32 %v1504_v26, %v1480_v54 }
 0x3ba   :  { %v1438_v49 = vpop.f32.mrf.mxu3 }
 0x3bb   :  { %v1380_v37 = vpop.f32.mrf.mxu1  ;;  %v1520_v29 = vadd.f32 %v1945_v21, %v1512_v23 }
 0x3bd   :  { %v1528_v48 = vmax.f32 %v1520_v29, 0.0 }
 0x3be   :  { %v1409_v15 = vpop.f32.mrf.mxu2 }
 0x3bf   :  { %v1410_v51 = vadd.f32 %v1409_v15, %v1380_v37  ;;  %1536 = vst [vmem:[#allocation7 + $0x30] sm:$0xff] %v1528_v48 }
 0x3c1   :  { %v1439_v16 = vadd.f32 %v1438_v49, %v1410_v51 }
 0x3c2   :  { %v1441_v55 = vpop.f32.mrf.mxu3 }
 0x3c3   :  { %v1475_v33 = vmul.f32 %v1457_v62, %v1439_v16  ;;  %v1383_v52 = vpop.f32.mrf.mxu1  ;;  %v1947_v62 = vld [vmem:[%s3142_s0 + $0x18] sm:$0xff] }
 0x3c5   :  { %v1507_v4 = vadd.f32 %v1489_v39, %v1475_v33 }
 0x3c6   :  { %v1412_v50 = vpop.f32.mrf.mxu2 }
 0x3c7   :  { %v1515_v45 = vadd.f32 %v1946_v60, %v1507_v4  ;;  %v1413_v38 = vadd.f32 %v1412_v50, %v1383_v52 }
 0x3c9   :  { %v1523_v1 = vmax.f32 %v1515_v45, 0.0  ;;  %v1442_v17 = vadd.f32 %v1441_v55, %v1413_v38 }
 0x3ca   :  { %v1444_v5 = vpop.f32.mrf.mxu3 }
 0x3cb   :  { %1531 = vst [vmem:[#allocation7 + $0x8] sm:$0xff] %v1523_v1  ;;  %v1477_v58 = vmul.f32 %v3100_v61, %v1442_v17  ;;  %v1386_v40 = vpop.f32.mrf.mxu1  ;;  %v1948_v61 = vld [vmem:[%s3142_s0 + $0x28] sm:$0xff] }
 0x3cd   :  { %v1509_v30 = vadd.f32 %v1494_v47, %v1477_v58 }
 0x3ce   :  { %v1415_v19 = vpop.f32.mrf.mxu2 }
 0x3cf   :  { %v1517_v25 = vadd.f32 %v1947_v62, %v1509_v30  ;;  %v1416_v43 = vadd.f32 %v1415_v19, %v1386_v40 }
 0x3d1   :  { %v1525_v63 = vmax.f32 %v1517_v25, 0.0  ;;  %v1445_v39 = vadd.f32 %v1444_v5, %v1416_v43 }
 0x3d2   :  { %v1447_v13 = vpop.f32.mrf.mxu3 }
 0x3d3   :  { %1533 = vst [vmem:[#allocation7 + $0x18] sm:$0xff] %v1525_v63  ;;  %v1479_v28 = vmul.f32 %v3102_v6, %v1445_v39  ;;  %v1389_v7 = vpop.f32.mrf.mxu1  ;;  %v1949_v6 = vld [vmem:[%s3142_s0 + $0x38] sm:$0xff] }
 0x3d5   :  { %v1511_v9 = vadd.f32 %v1499_v27, %v1479_v28 }
 0x3d6   :  { %v1418_v11 = vpop.f32.mrf.mxu2 }
 0x3d7   :  { %v1519_v24 = vadd.f32 %v1948_v61, %v1511_v9  ;;  %v1419_v20 = vadd.f32 %v1418_v11, %v1389_v7 }
 0x3d9   :  { %v1527_v53 = vmax.f32 %v1519_v24, 0.0  ;;  %v1448_v14 = vadd.f32 %v1447_v13, %v1419_v20 }
 0x3db   :  { %1535 = vst [vmem:[#allocation7 + $0x28] sm:$0xff] %v1527_v53  ;;  %v1481_v47 = vmul.f32 %v3107_v46, %v1448_v14 }
 0x3dd   :  { %v1513_v8 = vadd.f32 %v1504_v26, %v1481_v47 }
 0x3df   :  { %v1521_v22 = vadd.f32 %v1949_v6, %v1513_v8 }
 0x3e1   :  { %v1529_v3 = vmax.f32 %v1521_v22, 0.0 }
 0x3e3   :  { %1537 = vst [vmem:[#allocation7 + $0x38] sm:$0xff] %v1529_v3 }
 0x3e4   :  { %1550 = dma.vmem_to_hbm [thread:$0]  %s1543_s20, 1024, %s1545_s23, [#allocation4], %s2029_s13, %s2029_s13, %s2030_s14  }
 0x3e5   :  { %2026 = dma.done.wait [#allocation4], 1024  }
 0x3e6   :  { %2027 = vsyncadd [#allocation4], 4294966272 }
 0x3e7   :  { %1555 = vsyncpa [#allocation3], 1 }
 0x3e8   :  { %1556 = vsyncpa [#allocation6], 1 }
 0x3e9   :  { %1557 = vsyncpa [#allocation4], 1 }

</bundles_post_ra>
